<compile_context>
chip_gen: v6e
topology: v6e:2x2x1
jax: 0.10.0
libtpu: 0.0.40
codegen_flags: <defaults>
</compile_context>

<pallas_src>
import math
import functools

import jax
import jax.numpy as jnp
from jax import lax
from jax.experimental import pallas as pl
from jax.experimental.pallas import tpu as pltpu


# ---------------------------------------------------------------------------
# small helpers
# ---------------------------------------------------------------------------

def _round_up(x, m):
    return ((x + m - 1) // m) * m


def _channel_tile(d, target=256):
    """Channel tile for conv / scan kernels: full D if small, else a
    128-multiple that divides D."""
    if d <= target:
        return d
    for cand in (target, 128):
        if d % cand == 0:
            return cand
    return d


def _sigmoid(x):
    return 1.0 / (1.0 + jnp.exp(-x))


# ---------------------------------------------------------------------------
# tiled linear kernel:  out = act(x @ w + b) (+ residual)
#   weights stored pre-transposed as (Din, Dout) -> no call-time transpose.
# ---------------------------------------------------------------------------

def _linear_kernel(*args, activation, has_bias, has_residual):
    i = 0
    x_ref = args[i]; i += 1
    w_ref = args[i]; i += 1
    b_ref = None
    r_ref = None
    if has_bias:
        b_ref = args[i]; i += 1
    if has_residual:
        r_ref = args[i]; i += 1
    o_ref = args[i]; i += 1
    acc_ref = args[i]

    @pl.when(pl.program_id(2) == 0)
    def _():
        acc_ref[...] = jnp.zeros_like(acc_ref)

    acc_ref[...] += jnp.dot(x_ref[...], w_ref[...],
                            preferred_element_type=jnp.float32)

    @pl.when(pl.program_id(2) == pl.num_programs(2) - 1)
    def _():
        y = acc_ref[...]
        if has_bias:
            y = y + b_ref[...]
        if activation == "gelu":        # exact (erf) GELU, as F.gelu default
            y = 0.5 * y * (1.0 + lax.erf(y * jnp.float32(1.0 / math.sqrt(2.0))))
        elif activation == "silu":
            y = y * _sigmoid(y)
        elif activation == "softplus":  # numerically stable softplus
            y = jnp.maximum(y, 0.0) + jnp.log(1.0 + jnp.exp(-jnp.abs(y)))
        if has_residual:
            y = y + r_ref[...]
        o_ref[...] = y.astype(o_ref.dtype)


def linear(x, w, b=None, activation=None, residual=None,
           tm=256, tn=512, tk=512):
    """x:(M,K) @ w:(K,N) [+ b] with fused activation / residual epilogue."""
    M, K = x.shape
    Kw, N = w.shape
    assert K == Kw, (x.shape, w.shape)
    tm = min(tm, M)
    tn = min(tn, N)
    tk = min(tk, K)
    Mp, Np, Kp = _round_up(M, tm), _round_up(N, tn), _round_up(K, tk)

    xp = x if (Mp == M and Kp == K) else jnp.pad(x, ((0, Mp - M), (0, Kp - K)))
    wp = w if (Kp == K and Np == N) else jnp.pad(w, ((0, Kp - K), (0, Np - N)))

    has_bias = b is not None
    has_res = residual is not None

    inputs = [xp, wp]
    in_specs = [pl.BlockSpec((tm, tk), lambda i, j, k: (i, k)),
                pl.BlockSpec((tk, tn), lambda i, j, k: (k, j))]
    if has_bias:
        b2 = b.reshape(1, N)
        if Np != N:
            b2 = jnp.pad(b2, ((0, 0), (0, Np - N)))
        inputs.append(b2)
        in_specs.append(pl.BlockSpec((1, tn), lambda i, j, k: (0, j)))
    if has_res:
        r = residual
        if Mp != M or Np != N:
            r = jnp.pad(r, ((0, Mp - M), (0, Np - N)))
        inputs.append(r)
        in_specs.append(pl.BlockSpec((tm, tn), lambda i, j, k: (i, j)))

    out = pl.pallas_call(
        functools.partial(_linear_kernel, activation=activation,
                          has_bias=has_bias, has_residual=has_res),
        out_shape=jax.ShapeDtypeStruct((Mp, Np), jnp.float32),
        grid=(Mp // tm, Np // tn, Kp // tk),
        in_specs=in_specs,
        out_specs=pl.BlockSpec((tm, tn), lambda i, j, k: (i, j)),
        scratch_shapes=[pltpu.VMEM((tm, tn), jnp.float32)],
        compiler_params=pltpu.CompilerParams(
            dimension_semantics=("parallel", "parallel", "arbitrary")),
    )(*inputs)

    if Mp != M or Np != N:
        out = out[:M, :N]
    return out


# ---------------------------------------------------------------------------
# row-tiled LayerNorm
# ---------------------------------------------------------------------------

def _layernorm_kernel(x_ref, g_ref, b_ref, o_ref, *, eps):
    x = x_ref[...].astype(jnp.float32)
    mean = jnp.mean(x, axis=-1, keepdims=True)
    var = jnp.mean((x - mean) * (x - mean), axis=-1, keepdims=True)
    y = (x - mean) * lax.rsqrt(var + eps)
    o_ref[...] = (y * g_ref[...] + b_ref[...]).astype(o_ref.dtype)


def layernorm(x, gamma, beta, eps=1e-5, tm=512):
    M, D = x.shape
    tm = min(tm, M)
    Mp = _round_up(M, tm)
    xp = x if Mp == M else jnp.pad(x, ((0, Mp - M), (0, 0)))
    out = pl.pallas_call(
        functools.partial(_layernorm_kernel, eps=eps),
        out_shape=jax.ShapeDtypeStruct((Mp, D), jnp.float32),
        grid=(Mp // tm,),
        in_specs=[pl.BlockSpec((tm, D), lambda i: (i, 0)),
                  pl.BlockSpec((1, D), lambda i: (0, 0)),
                  pl.BlockSpec((1, D), lambda i: (0, 0))],
        out_specs=pl.BlockSpec((tm, D), lambda i: (i, 0)),
        compiler_params=pltpu.CompilerParams(
            dimension_semantics=("parallel",)),
    )(xp, gamma.reshape(1, D), beta.reshape(1, D))
    return out[:M] if Mp != M else out


# ---------------------------------------------------------------------------
# fused depthwise causal conv1d (kernel K, 'same'/causal) + SiLU
# ---------------------------------------------------------------------------

def _causal_conv_silu_kernel(x_ref, w_ref, o_ref, *, ksize):
    # x_ref: (L, td), w_ref: (ksize, td);  out[t] = sum_k w[k] * x[t+k-(K-1)]
    x = x_ref[...].astype(jnp.float32)
    L, td = x.shape
    acc = x * w_ref[pl.ds(ksize - 1, 1), :]
    for k in range(ksize - 1):
        shift = ksize - 1 - k
        xs = jnp.concatenate(
            [jnp.zeros((shift, td), jnp.float32), x[:L - shift, :]], axis=0)
        acc = acc + xs * w_ref[pl.ds(k, 1), :]
    o_ref[...] = (acc * _sigmoid(acc)).astype(o_ref.dtype)


def causal_conv_silu(x, w):
    """x: (B, L, D); w: (K, D) depthwise kernel (= torch conv weight[d,0,k])."""
    B, L, D = x.shape
    K = w.shape[0]
    td = _channel_tile(D)
    return pl.pallas_call(
        functools.partial(_causal_conv_silu_kernel, ksize=K),
        out_shape=jax.ShapeDtypeStruct((B, L, D), jnp.float32),
        grid=(B, D // td),
        in_specs=[pl.BlockSpec((None, L, td), lambda b, j: (b, 0, j)),
                  pl.BlockSpec((K, td), lambda b, j: (0, j))],
        out_specs=pl.BlockSpec((None, L, td), lambda b, j: (b, 0, j)),
        compiler_params=pltpu.CompilerParams(
            dimension_semantics=("parallel", "parallel")),
    )(x, w)


# ---------------------------------------------------------------------------
# selective-scan recurrence kernel
#   h[0]   = Bbar[0] * u[0]
#   h[t]   = Abar[t-1] * h[t-1] + Bbar[t-1] * u[t-1]      (t >= 1)
#   y[t,d] = sum_n C[t,n] * h[t,n,d]
# where Abar = exp(dt * A), Bbar = (Abar - 1) / A, A = -exp(A_log).
# ---------------------------------------------------------------------------

def _ssm_scan_kernel(dt_ref, u_ref, c_ref, a_ref, y_ref, s_ref):
    # dt_ref/u_ref/y_ref: (L, td); c_ref: (L, N); a_ref: (N, td); s_ref: (N, td)
    L = dt_ref.shape[0]
    A = a_ref[...]
    s_ref[...] = jnp.zeros_like(s_ref)

    def body(t, carry):
        tm1 = jnp.maximum(t - 1, 0)
        dt_row = dt_ref[pl.ds(tm1, 1), :]                    # (1, td)
        u_row = u_ref[pl.ds(tm1, 1), :]                      # (1, td)
        a_bar = jnp.exp(dt_row * A)                          # (N, td)
        b_bar = jnp.where(jnp.abs(A) < 1e-5, dt_row,
                          (a_bar - 1.0) / (A + 1e-10))       # (N, td)
        s_new = a_bar * s_ref[...] + b_bar * u_row
        s_ref[...] = s_new
        c_row = c_ref[pl.ds(t, 1), :]                        # (1, N)
        y_row = jnp.dot(c_row, s_new,
                        preferred_element_type=jnp.float32)  # (1, td)
        y_ref[pl.ds(t, 1), :] = y_row.astype(y_ref.dtype)
        return carry

    lax.fori_loop(0, L, body, 0)


def ssm_scan(dt, u, c, a_neg):
    """dt, u: (B, L, D); c: (B, L, N); a_neg: (N, D)  ->  y: (B, L, D)."""
    B, L, D = dt.shape
    N = c.shape[-1]
    td = _channel_tile(D)
    return pl.pallas_call(
        _ssm_scan_kernel,
        out_shape=jax.ShapeDtypeStruct((B, L, D), jnp.float32),
        grid=(B, D // td),
        in_specs=[pl.BlockSpec((None, L, td), lambda b, j: (b, 0, j)),
                  pl.BlockSpec((None, L, td), lambda b, j: (b, 0, j)),
                  pl.BlockSpec((None, L, N), lambda b, j: (b, 0, 0)),
                  pl.BlockSpec((N, td), lambda b, j: (0, j))],
        out_specs=pl.BlockSpec((None, L, td), lambda b, j: (b, 0, j)),
        scratch_shapes=[pltpu.VMEM((N, td), jnp.float32)],
        compiler_params=pltpu.CompilerParams(
            dimension_semantics=("parallel", "parallel")),
    )(dt, u, c, a_neg)


# ---------------------------------------------------------------------------
# fused SSM gating epilogue: (y + u * D) * silu(z)
# ---------------------------------------------------------------------------

def _gate_kernel(y_ref, u_ref, z_ref, d_ref, o_ref):
    z = z_ref[...]
    o_ref[...] = ((y_ref[...] + u_ref[...] * d_ref[...]) *
                  (z * _sigmoid(z))).astype(o_ref.dtype)


def ssm_gate(y, u, z, d_param, tm=512):
    M, D = y.shape
    tm = min(tm, M)
    Mp = _round_up(M, tm)

    def padr(a):
        return a if Mp == M else jnp.pad(a, ((0, Mp - M), (0, 0)))

    out = pl.pallas_call(
        _gate_kernel,
        out_shape=jax.ShapeDtypeStruct((Mp, D), jnp.float32),
        grid=(Mp // tm,),
        in_specs=[pl.BlockSpec((tm, D), lambda i: (i, 0)),
                  pl.BlockSpec((tm, D), lambda i: (i, 0)),
                  pl.BlockSpec((tm, D), lambda i: (i, 0)),
                  pl.BlockSpec((1, D), lambda i: (0, 0))],
        out_specs=pl.BlockSpec((tm, D), lambda i: (i, 0)),
        compiler_params=pltpu.CompilerParams(
            dimension_semantics=("parallel",)),
    )(padr(y), padr(u), padr(z), d_param.reshape(1, D))
    return out[:M] if Mp != M else out


# ---------------------------------------------------------------------------
# parameters (deterministic synthetic init; linear weights pre-transposed)
# ---------------------------------------------------------------------------

def init_params(key, cfg):
    D = cfg["embed_dim"]; N = cfg["state_dim"]; R = cfg["dt_rank"]
    K = cfg["d_conv"]; H = D * cfg["mlp_mult"]
    V = cfg["vocab_size"]; Td = cfg["time_dim"]; depth = cfg["depth"]

    keys = iter(jax.random.split(key, 8 + depth * 8))

    def kaiming(k, fan_in, shape):
        return (math.sqrt(2.0 / fan_in)
                * jax.random.normal(k, shape)).astype(jnp.float32)

    def uniform(k, shape, bound):
        return jax.random.uniform(k, shape, jnp.float32, -bound, bound)

    params = {
        "tok_emb": (0.02 * jax.random.normal(next(keys), (V + 1, D))
                    ).astype(jnp.float32),
        "time_w1": kaiming(next(keys), Td, (Td, 4 * D)),
        "time_b1": jnp.zeros((4 * D,), jnp.float32),
        "time_w2": kaiming(next(keys), 4 * D, (4 * D, D)),
        "time_b2": jnp.zeros((D,), jnp.float32),
        "norm_out_g": jnp.ones((D,), jnp.float32),
        "norm_out_b": jnp.zeros((D,), jnp.float32),
        "head_w": kaiming(next(keys), D, (D, V)),
        "head_b": jnp.zeros((V,), jnp.float32),
        "layers": [],
    }
    for _ in range(depth):
        lyr = {
            "ln1_g": jnp.ones((D,), jnp.float32),
            "ln1_b": jnp.zeros((D,), jnp.float32),
            "ln2_g": jnp.ones((D,), jnp.float32),
            "ln2_b": jnp.zeros((D,), jnp.float32),
            # SelectiveScan (bias=False for in/out projections, as reference)
            "wz": kaiming(next(keys), D, (D, D)),
            "wp": kaiming(next(keys), D, (D, R + 2 * N)),
            "wdt": uniform(next(keys), (R, D), (R ** -0.5) * 0.1),
            "bdt": jnp.full((D,), math.log(math.expm1(0.001)), jnp.float32),
            "conv_w": uniform(next(keys), (K, D), 1.0 / math.sqrt(K)),
            "a_log": jnp.tile(
                jnp.log(jnp.arange(1, N + 1, dtype=jnp.float32))[:, None],
                (1, D)),                                       # (N, D)
            "d_param": jnp.ones((D,), jnp.float32),
            "wo": kaiming(next(keys), D, (D, D)),
            # MLP
            "wm1": kaiming(next(keys), D, (D, H)),
            "bm1": jnp.zeros((H,), jnp.float32),
            "wm2": kaiming(next(keys), H, (H, D)),
            "bm2": jnp.zeros((D,), jnp.float32),
        }
        params["layers"].append(lyr)
    return params


# ---------------------------------------------------------------------------
# forward pass (glue in plain JAX, hot paths in Pallas)
# ---------------------------------------------------------------------------

def forward(params, x_t, t, *, cfg):
    B, L = x_t.shape
    D = cfg["embed_dim"]
    N = cfg["state_dim"]
    R = cfg["dt_rank"]
    M = B * L

    # token embedding gather + tiny sinusoidal time frequencies (XLA glue)
    tok = jnp.take(params["tok_emb"], x_t, axis=0)             # (B, L, D)
    half = cfg["time_dim"] // 2
    inv = jnp.exp(-math.log(10000.0)
                  * jnp.arange(half, dtype=jnp.float32) / half)
    args = t.astype(jnp.float32)[:, None] * inv[None, :]
    t_sin = jnp.concatenate([jnp.sin(args), jnp.cos(args)], axis=-1)
    t_emb = linear(t_sin, params["time_w1"], params["time_b1"],
                   activation="silu")
    t_emb = linear(t_emb, params["time_w2"], params["time_b2"])
    h2d = (tok + t_emb[:, None, :]).reshape(M, D)

    for lyr in params["layers"]:
        # ---- SSM (SelectiveScan) block, pre-LN, dropout = identity ----
        xn = layernorm(h2d, lyr["ln1_g"], lyr["ln1_b"])
        z = linear(xn, lyr["wz"])                              # gate branch
        pproj = linear(xn, lyr["wp"])                          # (M, R + 2N)
        dt_un = pproj[:, :R]
        c_proj = pproj[:, R + N:]
        # NOTE: B_proj (cols R:R+N) is computed but unused in the reference
        # forward(); we match that graph.
        dt = linear(dt_un, lyr["wdt"], lyr["bdt"], activation="softplus")
        u3 = causal_conv_silu(xn.reshape(B, L, D), lyr["conv_w"])
        a_neg = -jnp.exp(lyr["a_log"])                         # (N, D)
        y3 = ssm_scan(dt.reshape(B, L, D), u3,
                      c_proj.reshape(B, L, N), a_neg)
        gated = ssm_gate(y3.reshape(M, D), u3.reshape(M, D), z,
                         lyr["d_param"])
        h2d = linear(gated, lyr["wo"], residual=h2d)           # fused residual

        # ---- MLP block, pre-LN ----
        xn2 = layernorm(h2d, lyr["ln2_g"], lyr["ln2_b"])
        ff = linear(xn2, lyr["wm1"], lyr["bm1"], activation="gelu")
        h2d = linear(ff, lyr["wm2"], lyr["bm2"], residual=h2d)

    h2d = layernorm(h2d, params["norm_out_g"], params["norm_out_b"])
    logits = linear(h2d, params["head_w"], params["head_b"])
    return logits.reshape(B, L, cfg["vocab_size"])


# ---------------------------------------------------------------------------

if __name__ == "__main__":
    cfg = dict(
        vocab_size=64,
        embed_dim=32,
        depth=2,
        mlp_mult=4,
        state_dim=16,
        d_conv=4,
        num_timesteps=100,
    )
    cfg["dt_rank"] = math.ceil(cfg["embed_dim"] / 16)
    cfg["time_dim"] = cfg["embed_dim"]          # embed_dim is even

    B, L = 2, 8
    key = jax.random.PRNGKey(0)
    pkey, xkey, tkey = jax.random.split(key, 3)
    params = init_params(pkey, cfg)

    # x_t may contain the mask token id (= vocab_size), as in diffusion inputs
    x_t = jax.random.randint(xkey, (B, L), 0, cfg["vocab_size"] + 1,
                             dtype=jnp.int32)
    t = jax.random.randint(tkey, (B,), 0, cfg["num_timesteps"],
                           dtype=jnp.int32)

    fwd = jax.jit(functools.partial(forward, cfg=cfg))
    logits = jax.block_until_ready(fwd(params, x_t, t))

    assert logits.shape == (B, L, cfg["vocab_size"]), logits.shape
    assert bool(jnp.all(jnp.isfinite(logits)))
    print("KERNEL_OK")
</pallas_src>

<mosaic_0001>
module attributes {stable_mosaic.version = 11 : i64} {
  func.func @_linear_kernel(%arg0: i32, %arg1: i32, %arg2: i32, %arg3: memref<2x128xf32, #tpu.memory_space<vmem>>, %arg4: memref<128x32xf32, #tpu.memory_space<vmem>>, %arg5: memref<1x32xf32, #tpu.memory_space<vmem>>, %arg6: memref<2x32xf32, #tpu.memory_space<vmem>>, %arg7: memref<2x32xf32, #tpu.memory_space<vmem>>) attributes {dimension_semantics = [#tpu.dimension_semantics<parallel>, #tpu.dimension_semantics<parallel>, #tpu.dimension_semantics<arbitrary>], iteration_bounds = array<i64: 1, 1, 1>, scalar_prefetch = 0 : i64, scratch_operands = 1 : i64, tpu.core_type = #tpu.core_type<tc>, window_params = [{transform_indices = @transform_0, window_bounds = array<i64: 2, 128>}, {transform_indices = @transform_1, window_bounds = array<i64: 128, 32>}, {transform_indices = @transform_2, window_bounds = array<i64: 1, 32>}, {transform_indices = @transform_3, window_bounds = array<i64: 2, 32>}]} {
    %c0_i32 = arith.constant 0 : i32
    %0 = arith.cmpi eq, %arg2, %c0_i32 : i32
    %1 = arith.extui %0 : i1 to i32
    %c0_i32_0 = arith.constant 0 : i32
    %2 = arith.cmpi ne, %1, %c0_i32_0 : i32
    scf.if %2 {
      %cst_10 = arith.constant 0.000000e+00 : f32
      %12 = vector.broadcast %cst_10 : f32 to vector<2x32xf32>
      %c0_11 = arith.constant 0 : index
      %c0_12 = arith.constant 0 : index
      %13 = vector.load %arg7[%c0_11, %c0_12] : memref<2x32xf32, #tpu.memory_space<vmem>>, vector<2x32xf32>
      tpu.vector_store %arg7[%c0_11, %c0_12], %12 {strides = array<i32>} : memref<2x32xf32, #tpu.memory_space<vmem>>, vector<2x32xf32>,
    } else {
    }
    %c0 = arith.constant 0 : index
    %c0_1 = arith.constant 0 : index
    %3 = vector.load %arg7[%c0, %c0_1] : memref<2x32xf32, #tpu.memory_space<vmem>>, vector<2x32xf32>
    %c0_2 = arith.constant 0 : index
    %c0_3 = arith.constant 0 : index
    %4 = vector.load %arg3[%c0_2, %c0_3] : memref<2x128xf32, #tpu.memory_space<vmem>>, vector<2x128xf32>
    %c0_4 = arith.constant 0 : index
    %c0_5 = arith.constant 0 : index
    %5 = vector.load %arg4[%c0_4, %c0_5] : memref<128x32xf32, #tpu.memory_space<vmem>>, vector<128x32xf32>
    %cst = arith.constant dense<0.000000e+00> : vector<2x32xf32>
    %6 = tpu.matmul %4, %5, %cst {dimension_numbers = #tpu.dot_dimension_numbers<[1], [0], [0], [1], [0, 0, 1, 1], [], []>} : vector<2x128xf32>, vector<128x32xf32>, vector<2x32xf32> -> vector<2x32xf32>
    %7 = arith.addf %3, %6 : vector<2x32xf32>
    %c0_6 = arith.constant 0 : index
    %c0_7 = arith.constant 0 : index
    %8 = vector.load %arg7[%c0_6, %c0_7] : memref<2x32xf32, #tpu.memory_space<vmem>>, vector<2x32xf32>
    tpu.vector_store %arg7[%c0_6, %c0_7], %7 {strides = array<i32>} : memref<2x32xf32, #tpu.memory_space<vmem>>, vector<2x32xf32>,
    %c0_i32_8 = arith.constant 0 : i32
    %9 = arith.cmpi eq, %arg2, %c0_i32_8 : i32
    %10 = arith.extui %9 : i1 to i32
    %c0_i32_9 = arith.constant 0 : i32
    %11 = arith.cmpi ne, %10, %c0_i32_9 : i32
    scf.if %11 {
      %c0_10 = arith.constant 0 : index
      %c0_11 = arith.constant 0 : index
      %12 = vector.load %arg7[%c0_10, %c0_11] : memref<2x32xf32, #tpu.memory_space<vmem>>, vector<2x32xf32>
      %c0_12 = arith.constant 0 : index
      %c0_13 = arith.constant 0 : index
      %13 = vector.load %arg5[%c0_12, %c0_13] : memref<1x32xf32, #tpu.memory_space<vmem>>, vector<1x32xf32>
      %14 = vector.broadcast %13 : vector<1x32xf32> to vector<2x32xf32>
      %15 = arith.addf %12, %14 : vector<2x32xf32>
      %c0_14 = arith.constant 0 : index
      %c0_15 = arith.constant 0 : index
      %16 = vector.load %arg6[%c0_14, %c0_15] : memref<2x32xf32, #tpu.memory_space<vmem>>, vector<2x32xf32>
      tpu.vector_store %arg6[%c0_14, %c0_15], %15 {strides = array<i32>} : memref<2x32xf32, #tpu.memory_space<vmem>>, vector<2x32xf32>,
    } else {
    }
    return
  }
  func.func @transform_0(%arg0: i32, %arg1: i32, %arg2: i32) -> (i32, i32) {
    %c0_i32 = arith.constant 0 : i32
    return %arg0, %arg2 : i32, i32
  }
  func.func @transform_1(%arg0: i32, %arg1: i32, %arg2: i32) -> (i32, i32) {
    %c0_i32 = arith.constant 0 : i32
    return %arg2, %arg1 : i32, i32
  }
  func.func @transform_2(%arg0: i32, %arg1: i32, %arg2: i32) -> (i32, i32) {
    %c0_i32 = arith.constant 0 : i32
    %c0_i32_0 = arith.constant 0 : i32
    return %c0_i32, %arg1 : i32, i32
  }
  func.func @transform_3(%arg0: i32, %arg1: i32, %arg2: i32) -> (i32, i32) {
    %c0_i32 = arith.constant 0 : i32
    return %arg0, %arg1 : i32, i32
  }
}

module attributes {stable_mosaic.version = 11 : i64} {
  func.func @_linear_kernel(%arg0: i32, %arg1: i32, %arg2: i32, %arg3: memref<2x32xf32, #tpu.memory_space<vmem>>, %arg4: memref<32x128xf32, #tpu.memory_space<vmem>>, %arg5: memref<1x128xf32, #tpu.memory_space<vmem>>, %arg6: memref<2x128xf32, #tpu.memory_space<vmem>>, %arg7: memref<2x128xf32, #tpu.memory_space<vmem>>) attributes {dimension_semantics = [#tpu.dimension_semantics<parallel>, #tpu.dimension_semantics<parallel>, #tpu.dimension_semantics<arbitrary>], iteration_bounds = array<i64: 1, 1, 1>, scalar_prefetch = 0 : i64, scratch_operands = 1 : i64, tpu.core_type = #tpu.core_type<tc>, window_params = [{transform_indices = @transform_0, window_bounds = array<i64: 2, 32>}, {transform_indices = @transform_1, window_bounds = array<i64: 32, 128>}, {transform_indices = @transform_2, window_bounds = array<i64: 1, 128>}, {transform_indices = @transform_3, window_bounds = array<i64: 2, 128>}]} {
    %c0_i32 = arith.constant 0 : i32
    %0 = arith.cmpi eq, %arg2, %c0_i32 : i32
    %1 = arith.extui %0 : i1 to i32
    %c0_i32_0 = arith.constant 0 : i32
    %2 = arith.cmpi ne, %1, %c0_i32_0 : i32
    scf.if %2 {
      %cst_10 = arith.constant 0.000000e+00 : f32
      %12 = vector.broadcast %cst_10 : f32 to vector<2x128xf32>
      %c0_11 = arith.constant 0 : index
      %c0_12 = arith.constant 0 : index
      %13 = vector.load %arg7[%c0_11, %c0_12] : memref<2x128xf32, #tpu.memory_space<vmem>>, vector<2x128xf32>
      tpu.vector_store %arg7[%c0_11, %c0_12], %12 {strides = array<i32>} : memref<2x128xf32, #tpu.memory_space<vmem>>, vector<2x128xf32>,
    } else {
    }
    %c0 = arith.constant 0 : index
    %c0_1 = arith.constant 0 : index
    %3 = vector.load %arg7[%c0, %c0_1] : memref<2x128xf32, #tpu.memory_space<vmem>>, vector<2x128xf32>
    %c0_2 = arith.constant 0 : index
    %c0_3 = arith.constant 0 : index
    %4 = vector.load %arg3[%c0_2, %c0_3] : memref<2x32xf32, #tpu.memory_space<vmem>>, vector<2x32xf32>
    %c0_4 = arith.constant 0 : index
    %c0_5 = arith.constant 0 : index
    %5 = vector.load %arg4[%c0_4, %c0_5] : memref<32x128xf32, #tpu.memory_space<vmem>>, vector<32x128xf32>
    %cst = arith.constant dense<0.000000e+00> : vector<2x128xf32>
    %6 = tpu.matmul %4, %5, %cst {dimension_numbers = #tpu.dot_dimension_numbers<[1], [0], [0], [1], [0, 0, 1, 1], [], []>} : vector<2x32xf32>, vector<32x128xf32>, vector<2x128xf32> -> vector<2x128xf32>
    %7 = arith.addf %3, %6 : vector<2x128xf32>
    %c0_6 = arith.constant 0 : index
    %c0_7 = arith.constant 0 : index
    %8 = vector.load %arg7[%c0_6, %c0_7] : memref<2x128xf32, #tpu.memory_space<vmem>>, vector<2x128xf32>
    tpu.vector_store %arg7[%c0_6, %c0_7], %7 {strides = array<i32>} : memref<2x128xf32, #tpu.memory_space<vmem>>, vector<2x128xf32>,
    %c0_i32_8 = arith.constant 0 : i32
    %9 = arith.cmpi eq, %arg2, %c0_i32_8 : i32
    %10 = arith.extui %9 : i1 to i32
    %c0_i32_9 = arith.constant 0 : i32
    %11 = arith.cmpi ne, %10, %c0_i32_9 : i32
    scf.if %11 {
      %c0_10 = arith.constant 0 : index
      %c0_11 = arith.constant 0 : index
      %12 = vector.load %arg7[%c0_10, %c0_11] : memref<2x128xf32, #tpu.memory_space<vmem>>, vector<2x128xf32>
      %c0_12 = arith.constant 0 : index
      %c0_13 = arith.constant 0 : index
      %13 = vector.load %arg5[%c0_12, %c0_13] : memref<1x128xf32, #tpu.memory_space<vmem>>, vector<1x128xf32>
      %14 = vector.broadcast %13 : vector<1x128xf32> to vector<2x128xf32>
      %15 = arith.addf %12, %14 : vector<2x128xf32>
      %cst_14 = arith.constant 0.000000e+00 : f32
      %16 = vector.broadcast %cst_14 : f32 to vector<2x128xf32>
      %17 = arith.subf %16, %15 : vector<2x128xf32>
      %18 = math.exp %17 : vector<2x128xf32>
      %cst_15 = arith.constant 1.000000e+00 : f32
      %19 = vector.broadcast %cst_15 : f32 to vector<2x128xf32>
      %20 = arith.addf %19, %18 : vector<2x128xf32>
      %cst_16 = arith.constant 1.000000e+00 : f32
      %21 = vector.broadcast %cst_16 : f32 to vector<2x128xf32>
      %22 = arith.divf %21, %20 : vector<2x128xf32>
      %23 = arith.mulf %15, %22 : vector<2x128xf32>
      %c0_17 = arith.constant 0 : index
      %c0_18 = arith.constant 0 : index
      %24 = vector.load %arg6[%c0_17, %c0_18] : memref<2x128xf32, #tpu.memory_space<vmem>>, vector<2x128xf32>
      tpu.vector_store %arg6[%c0_17, %c0_18], %23 {strides = array<i32>} : memref<2x128xf32, #tpu.memory_space<vmem>>, vector<2x128xf32>,
    } else {
    }
    return
  }
  func.func @transform_0(%arg0: i32, %arg1: i32, %arg2: i32) -> (i32, i32) {
    %c0_i32 = arith.constant 0 : i32
    return %arg0, %arg2 : i32, i32
  }
  func.func @transform_1(%arg0: i32, %arg1: i32, %arg2: i32) -> (i32, i32) {
    %c0_i32 = arith.constant 0 : i32
    return %arg2, %arg1 : i32, i32
  }
  func.func @transform_2(%arg0: i32, %arg1: i32, %arg2: i32) -> (i32, i32) {
    %c0_i32 = arith.constant 0 : i32
    %c0_i32_0 = arith.constant 0 : i32
    return %c0_i32, %arg1 : i32, i32
  }
  func.func @transform_3(%arg0: i32, %arg1: i32, %arg2: i32) -> (i32, i32) {
    %c0_i32 = arith.constant 0 : i32
    return %arg0, %arg1 : i32, i32
  }
}

module attributes {stable_mosaic.version = 11 : i64} {
  func.func @_layernorm_kernel(%arg0: i32, %arg1: memref<16x32xf32, #tpu.memory_space<vmem>>, %arg2: memref<1x32xf32, #tpu.memory_space<vmem>>, %arg3: memref<1x32xf32, #tpu.memory_space<vmem>>, %arg4: memref<16x32xf32, #tpu.memory_space<vmem>>) attributes {dimension_semantics = [#tpu.dimension_semantics<parallel>], iteration_bounds = array<i64: 1>, scalar_prefetch = 0 : i64, scratch_operands = 0 : i64, tpu.core_type = #tpu.core_type<tc>, window_params = [{transform_indices = @transform_0, window_bounds = array<i64: 16, 32>}, {pipeline_mode = #tpu.pipeline_mode<synchronous>, transform_indices = @transform_1, window_bounds = array<i64: 1, 32>}, {pipeline_mode = #tpu.pipeline_mode<synchronous>, transform_indices = @transform_2, window_bounds = array<i64: 1, 32>}, {transform_indices = @transform_3, window_bounds = array<i64: 16, 32>}]} {
    %c0 = arith.constant 0 : index
    %c0_0 = arith.constant 0 : index
    %0 = vector.load %arg1[%c0, %c0_0] : memref<16x32xf32, #tpu.memory_space<vmem>>, vector<16x32xf32>
    %cst = arith.constant dense<0.000000e+00> : vector<16xf32>
    %1 = vector.multi_reduction <add>, %0, %cst [1] : vector<16x32xf32> to vector<16xf32>
    %2 = vector.shape_cast %1 : vector<16xf32> to vector<16x1xf32>
    %cst_1 = arith.constant 3.200000e+01 : f32
    %3 = vector.broadcast %cst_1 : f32 to vector<16x1xf32>
    %4 = arith.divf %2, %3 : vector<16x1xf32>
    %5 = vector.broadcast %4 : vector<16x1xf32> to vector<16x32xf32>
    %6 = arith.subf %0, %5 : vector<16x32xf32>
    %7 = vector.broadcast %4 : vector<16x1xf32> to vector<16x32xf32>
    %8 = arith.subf %0, %7 : vector<16x32xf32>
    %9 = arith.mulf %6, %8 : vector<16x32xf32>
    %cst_2 = arith.constant dense<0.000000e+00> : vector<16xf32>
    %10 = vector.multi_reduction <add>, %9, %cst_2 [1] : vector<16x32xf32> to vector<16xf32>
    %11 = vector.shape_cast %10 : vector<16xf32> to vector<16x1xf32>
    %cst_3 = arith.constant 3.200000e+01 : f32
    %12 = vector.broadcast %cst_3 : f32 to vector<16x1xf32>
    %13 = arith.divf %11, %12 : vector<16x1xf32>
    %14 = vector.broadcast %4 : vector<16x1xf32> to vector<16x32xf32>
    %15 = arith.subf %0, %14 : vector<16x32xf32>
    %cst_4 = arith.constant 9.99999974E-6 : f32
    %16 = vector.broadcast %cst_4 : f32 to vector<16x1xf32>
    %17 = arith.addf %13, %16 : vector<16x1xf32>
    %18 = math.rsqrt %17 : vector<16x1xf32>
    %19 = vector.broadcast %18 : vector<16x1xf32> to vector<16x32xf32>
    %20 = arith.mulf %15, %19 : vector<16x32xf32>
    %c0_5 = arith.constant 0 : index
    %c0_6 = arith.constant 0 : index
    %21 = vector.load %arg2[%c0_5, %c0_6] : memref<1x32xf32, #tpu.memory_space<vmem>>, vector<1x32xf32>
    %22 = vector.broadcast %21 : vector<1x32xf32> to vector<16x32xf32>
    %23 = arith.mulf %20, %22 : vector<16x32xf32>
    %c0_7 = arith.constant 0 : index
    %c0_8 = arith.constant 0 : index
    %24 = vector.load %arg3[%c0_7, %c0_8] : memref<1x32xf32, #tpu.memory_space<vmem>>, vector<1x32xf32>
    %25 = vector.broadcast %24 : vector<1x32xf32> to vector<16x32xf32>
    %26 = arith.addf %23, %25 : vector<16x32xf32>
    %c0_9 = arith.constant 0 : index
    %c0_10 = arith.constant 0 : index
    %27 = vector.load %arg4[%c0_9, %c0_10] : memref<16x32xf32, #tpu.memory_space<vmem>>, vector<16x32xf32>
    tpu.vector_store %arg4[%c0_9, %c0_10], %26 {strides = array<i32>} : memref<16x32xf32, #tpu.memory_space<vmem>>, vector<16x32xf32>,
    return
  }
  func.func @transform_0(%arg0: i32) -> (i32, i32) {
    %c0_i32 = arith.constant 0 : i32
    %c0_i32_0 = arith.constant 0 : i32
    return %arg0, %c0_i32 : i32, i32
  }
  func.func @transform_1(%arg0: i32) -> (i32, i32) {
    %c0_i32 = arith.constant 0 : i32
    %c0_i32_0 = arith.constant 0 : i32
    %c0_i32_1 = arith.constant 0 : i32
    return %c0_i32, %c0_i32_0 : i32, i32
  }
  func.func @transform_2(%arg0: i32) -> (i32, i32) {
    %c0_i32 = arith.constant 0 : i32
    %c0_i32_0 = arith.constant 0 : i32
    %c0_i32_1 = arith.constant 0 : i32
    return %c0_i32, %c0_i32_0 : i32, i32
  }
  func.func @transform_3(%arg0: i32) -> (i32, i32) {
    %c0_i32 = arith.constant 0 : i32
    %c0_i32_0 = arith.constant 0 : i32
    return %arg0, %c0_i32 : i32, i32
  }
}

module attributes {stable_mosaic.version = 11 : i64} {
  func.func @_linear_kernel(%arg0: i32, %arg1: i32, %arg2: i32, %arg3: memref<16x32xf32, #tpu.memory_space<vmem>>, %arg4: memref<32x34xf32, #tpu.memory_space<vmem>>, %arg5: memref<16x34xf32, #tpu.memory_space<vmem>>, %arg6: memref<16x34xf32, #tpu.memory_space<vmem>>) attributes {dimension_semantics = [#tpu.dimension_semantics<parallel>, #tpu.dimension_semantics<parallel>, #tpu.dimension_semantics<arbitrary>], iteration_bounds = array<i64: 1, 1, 1>, scalar_prefetch = 0 : i64, scratch_operands = 1 : i64, tpu.core_type = #tpu.core_type<tc>, window_params = [{transform_indices = @transform_0, window_bounds = array<i64: 16, 32>}, {transform_indices = @transform_1, window_bounds = array<i64: 32, 34>}, {transform_indices = @transform_2, window_bounds = array<i64: 16, 34>}]} {
    %c0_i32 = arith.constant 0 : i32
    %0 = arith.cmpi eq, %arg2, %c0_i32 : i32
    %1 = arith.extui %0 : i1 to i32
    %c0_i32_0 = arith.constant 0 : i32
    %2 = arith.cmpi ne, %1, %c0_i32_0 : i32
    scf.if %2 {
      %cst_10 = arith.constant 0.000000e+00 : f32
      %12 = vector.broadcast %cst_10 : f32 to vector<16x34xf32>
      %c0_11 = arith.constant 0 : index
      %c0_12 = arith.constant 0 : index
      %13 = vector.load %arg6[%c0_11, %c0_12] : memref<16x34xf32, #tpu.memory_space<vmem>>, vector<16x34xf32>
      tpu.vector_store %arg6[%c0_11, %c0_12], %12 {strides = array<i32>} : memref<16x34xf32, #tpu.memory_space<vmem>>, vector<16x34xf32>,
    } else {
    }
    %c0 = arith.constant 0 : index
    %c0_1 = arith.constant 0 : index
    %3 = vector.load %arg6[%c0, %c0_1] : memref<16x34xf32, #tpu.memory_space<vmem>>, vector<16x34xf32>
    %c0_2 = arith.constant 0 : index
    %c0_3 = arith.constant 0 : index
    %4 = vector.load %arg3[%c0_2, %c0_3] : memref<16x32xf32, #tpu.memory_space<vmem>>, vector<16x32xf32>
    %c0_4 = arith.constant 0 : index
    %c0_5 = arith.constant 0 : index
    %5 = vector.load %arg4[%c0_4, %c0_5] : memref<32x34xf32, #tpu.memory_space<vmem>>, vector<32x34xf32>
    %cst = arith.constant dense<0.000000e+00> : vector<16x34xf32>
    %6 = tpu.matmul %4, %5, %cst {dimension_numbers = #tpu.dot_dimension_numbers<[1], [0], [0], [1], [0, 0, 1, 1], [], []>} : vector<16x32xf32>, vector<32x34xf32>, vector<16x34xf32> -> vector<16x34xf32>
    %7 = arith.addf %3, %6 : vector<16x34xf32>
    %c0_6 = arith.constant 0 : index
    %c0_7 = arith.constant 0 : index
    %8 = vector.load %arg6[%c0_6, %c0_7] : memref<16x34xf32, #tpu.memory_space<vmem>>, vector<16x34xf32>
    tpu.vector_store %arg6[%c0_6, %c0_7], %7 {strides = array<i32>} : memref<16x34xf32, #tpu.memory_space<vmem>>, vector<16x34xf32>,
    %c0_i32_8 = arith.constant 0 : i32
    %9 = arith.cmpi eq, %arg2, %c0_i32_8 : i32
    %10 = arith.extui %9 : i1 to i32
    %c0_i32_9 = arith.constant 0 : i32
    %11 = arith.cmpi ne, %10, %c0_i32_9 : i32
    scf.if %11 {
      %c0_10 = arith.constant 0 : index
      %c0_11 = arith.constant 0 : index
      %12 = vector.load %arg6[%c0_10, %c0_11] : memref<16x34xf32, #tpu.memory_space<vmem>>, vector<16x34xf32>
      %c0_12 = arith.constant 0 : index
      %c0_13 = arith.constant 0 : index
      %13 = vector.load %arg5[%c0_12, %c0_13] : memref<16x34xf32, #tpu.memory_space<vmem>>, vector<16x34xf32>
      tpu.vector_store %arg5[%c0_12, %c0_13], %12 {strides = array<i32>} : memref<16x34xf32, #tpu.memory_space<vmem>>, vector<16x34xf32>,
    } else {
    }
    return
  }
  func.func @transform_0(%arg0: i32, %arg1: i32, %arg2: i32) -> (i32, i32) {
    %c0_i32 = arith.constant 0 : i32
    return %arg0, %arg2 : i32, i32
  }
  func.func @transform_1(%arg0: i32, %arg1: i32, %arg2: i32) -> (i32, i32) {
    %c0_i32 = arith.constant 0 : i32
    return %arg2, %arg1 : i32, i32
  }
  func.func @transform_2(%arg0: i32, %arg1: i32, %arg2: i32) -> (i32, i32) {
    %c0_i32 = arith.constant 0 : i32
    return %arg0, %arg1 : i32, i32
  }
}

module attributes {stable_mosaic.version = 11 : i64} {
  func.func @_causal_conv_silu_kernel(%arg0: i32, %arg1: i32, %arg2: memref<1x8x32xf32, #tpu.memory_space<vmem>>, %arg3: memref<4x32xf32, #tpu.memory_space<vmem>>, %arg4: memref<1x8x32xf32, #tpu.memory_space<vmem>>) attributes {dimension_semantics = [#tpu.dimension_semantics<parallel>, #tpu.dimension_semantics<parallel>], iteration_bounds = array<i64: 2, 1>, scalar_prefetch = 0 : i64, scratch_operands = 0 : i64, tpu.core_type = #tpu.core_type<tc>, window_params = [{transform_indices = @transform_0, window_bounds = array<i64: 1, 8, 32>}, {transform_indices = @transform_1, window_bounds = array<i64: 4, 32>}, {transform_indices = @transform_2, window_bounds = array<i64: 1, 8, 32>}]} {
    %c0 = arith.constant 0 : index
    %c0_0 = arith.constant 0 : index
    %c0_1 = arith.constant 0 : index
    %0 = vector.load %arg2[%c0, %c0_0, %c0_1] : memref<1x8x32xf32, #tpu.memory_space<vmem>>, vector<1x8x32xf32>
    %1 = vector.shape_cast %0 : vector<1x8x32xf32> to vector<8x32xf32>
    %c3 = arith.constant 3 : index
    %c0_2 = arith.constant 0 : index
    %2 = vector.load %arg3[%c3, %c0_2] : memref<4x32xf32, #tpu.memory_space<vmem>>, vector<1x32xf32>
    %3 = vector.broadcast %2 : vector<1x32xf32> to vector<8x32xf32>
    %4 = arith.mulf %1, %3 : vector<8x32xf32>
    %cst = arith.constant 0.000000e+00 : f32
    %5 = vector.broadcast %cst : f32 to vector<3x32xf32>
    %6 = vector.extract_strided_slice %1 {offsets = [0, 0], sizes = [5, 32], strides = [1, 1]} : vector<8x32xf32> to vector<5x32xf32>
    %7 = tpu.concatenate %5, %6 in 0 : vector<3x32xf32>, vector<5x32xf32> -> vector<8x32xf32>
    %c0_3 = arith.constant 0 : index
    %c0_4 = arith.constant 0 : index
    %8 = vector.load %arg3[%c0_3, %c0_4] : memref<4x32xf32, #tpu.memory_space<vmem>>, vector<1x32xf32>
    %9 = vector.broadcast %8 : vector<1x32xf32> to vector<8x32xf32>
    %10 = arith.mulf %7, %9 : vector<8x32xf32>
    %11 = arith.addf %4, %10 : vector<8x32xf32>
    %cst_5 = arith.constant 0.000000e+00 : f32
    %12 = vector.broadcast %cst_5 : f32 to vector<2x32xf32>
    %13 = vector.extract_strided_slice %1 {offsets = [0, 0], sizes = [6, 32], strides = [1, 1]} : vector<8x32xf32> to vector<6x32xf32>
    %14 = tpu.concatenate %12, %13 in 0 : vector<2x32xf32>, vector<6x32xf32> -> vector<8x32xf32>
    %c1 = arith.constant 1 : index
    %c0_6 = arith.constant 0 : index
    %15 = vector.load %arg3[%c1, %c0_6] : memref<4x32xf32, #tpu.memory_space<vmem>>, vector<1x32xf32>
    %16 = vector.broadcast %15 : vector<1x32xf32> to vector<8x32xf32>
    %17 = arith.mulf %14, %16 : vector<8x32xf32>
    %18 = arith.addf %11, %17 : vector<8x32xf32>
    %cst_7 = arith.constant 0.000000e+00 : f32
    %19 = vector.broadcast %cst_7 : f32 to vector<1x32xf32>
    %20 = vector.extract_strided_slice %1 {offsets = [0, 0], sizes = [7, 32], strides = [1, 1]} : vector<8x32xf32> to vector<7x32xf32>
    %21 = tpu.concatenate %19, %20 in 0 : vector<1x32xf32>, vector<7x32xf32> -> vector<8x32xf32>
    %c2 = arith.constant 2 : index
    %c0_8 = arith.constant 0 : index
    %22 = vector.load %arg3[%c2, %c0_8] : memref<4x32xf32, #tpu.memory_space<vmem>>, vector<1x32xf32>
    %23 = vector.broadcast %22 : vector<1x32xf32> to vector<8x32xf32>
    %24 = arith.mulf %21, %23 : vector<8x32xf32>
    %25 = arith.addf %18, %24 : vector<8x32xf32>
    %cst_9 = arith.constant 0.000000e+00 : f32
    %26 = vector.broadcast %cst_9 : f32 to vector<8x32xf32>
    %27 = arith.subf %26, %25 : vector<8x32xf32>
    %28 = math.exp %27 : vector<8x32xf32>
    %cst_10 = arith.constant 1.000000e+00 : f32
    %29 = vector.broadcast %cst_10 : f32 to vector<8x32xf32>
    %30 = arith.addf %29, %28 : vector<8x32xf32>
    %cst_11 = arith.constant 1.000000e+00 : f32
    %31 = vector.broadcast %cst_11 : f32 to vector<8x32xf32>
    %32 = arith.divf %31, %30 : vector<8x32xf32>
    %33 = arith.mulf %25, %32 : vector<8x32xf32>
    %c0_12 = arith.constant 0 : index
    %c0_13 = arith.constant 0 : index
    %c0_14 = arith.constant 0 : index
    %34 = vector.load %arg4[%c0_12, %c0_13, %c0_14] : memref<1x8x32xf32, #tpu.memory_space<vmem>>, vector<1x8x32xf32>
    %35 = vector.shape_cast %34 : vector<1x8x32xf32> to vector<8x32xf32>
    %36 = vector.shape_cast %33 : vector<8x32xf32> to vector<1x8x32xf32>
    tpu.vector_store %arg4[%c0_12, %c0_13, %c0_14], %36 {strides = array<i32>} : memref<1x8x32xf32, #tpu.memory_space<vmem>>, vector<1x8x32xf32>,
    return
  }
  func.func @transform_0(%arg0: i32, %arg1: i32) -> (i32, i32, i32) {
    %c0_i32 = arith.constant 0 : i32
    %c0_i32_0 = arith.constant 0 : i32
    return %arg0, %c0_i32, %arg1 : i32, i32, i32
  }
  func.func @transform_1(%arg0: i32, %arg1: i32) -> (i32, i32) {
    %c0_i32 = arith.constant 0 : i32
    %c0_i32_0 = arith.constant 0 : i32
    return %c0_i32, %arg1 : i32, i32
  }
  func.func @transform_2(%arg0: i32, %arg1: i32) -> (i32, i32, i32) {
    %c0_i32 = arith.constant 0 : i32
    %c0_i32_0 = arith.constant 0 : i32
    return %arg0, %c0_i32, %arg1 : i32, i32, i32
  }
}

module attributes {stable_mosaic.version = 11 : i64} {
  func.func @_linear_kernel(%arg0: i32, %arg1: i32, %arg2: i32, %arg3: memref<16x2xf32, #tpu.memory_space<vmem>>, %arg4: memref<2x32xf32, #tpu.memory_space<vmem>>, %arg5: memref<1x32xf32, #tpu.memory_space<vmem>>, %arg6: memref<16x32xf32, #tpu.memory_space<vmem>>, %arg7: memref<16x32xf32, #tpu.memory_space<vmem>>) attributes {dimension_semantics = [#tpu.dimension_semantics<parallel>, #tpu.dimension_semantics<parallel>, #tpu.dimension_semantics<arbitrary>], iteration_bounds = array<i64: 1, 1, 1>, scalar_prefetch = 0 : i64, scratch_operands = 1 : i64, tpu.core_type = #tpu.core_type<tc>, window_params = [{transform_indices = @transform_0, window_bounds = array<i64: 16, 2>}, {transform_indices = @transform_1, window_bounds = array<i64: 2, 32>}, {transform_indices = @transform_2, window_bounds = array<i64: 1, 32>}, {transform_indices = @transform_3, window_bounds = array<i64: 16, 32>}]} {
    %c0_i32 = arith.constant 0 : i32
    %0 = arith.cmpi eq, %arg2, %c0_i32 : i32
    %1 = arith.extui %0 : i1 to i32
    %c0_i32_0 = arith.constant 0 : i32
    %2 = arith.cmpi ne, %1, %c0_i32_0 : i32
    scf.if %2 {
      %cst_10 = arith.constant 0.000000e+00 : f32
      %12 = vector.broadcast %cst_10 : f32 to vector<16x32xf32>
      %c0_11 = arith.constant 0 : index
      %c0_12 = arith.constant 0 : index
      %13 = vector.load %arg7[%c0_11, %c0_12] : memref<16x32xf32, #tpu.memory_space<vmem>>, vector<16x32xf32>
      tpu.vector_store %arg7[%c0_11, %c0_12], %12 {strides = array<i32>} : memref<16x32xf32, #tpu.memory_space<vmem>>, vector<16x32xf32>,
    } else {
    }
    %c0 = arith.constant 0 : index
    %c0_1 = arith.constant 0 : index
    %3 = vector.load %arg7[%c0, %c0_1] : memref<16x32xf32, #tpu.memory_space<vmem>>, vector<16x32xf32>
    %c0_2 = arith.constant 0 : index
    %c0_3 = arith.constant 0 : index
    %4 = vector.load %arg3[%c0_2, %c0_3] : memref<16x2xf32, #tpu.memory_space<vmem>>, vector<16x2xf32>
    %c0_4 = arith.constant 0 : index
    %c0_5 = arith.constant 0 : index
    %5 = vector.load %arg4[%c0_4, %c0_5] : memref<2x32xf32, #tpu.memory_space<vmem>>, vector<2x32xf32>
    %cst = arith.constant dense<0.000000e+00> : vector<16x32xf32>
    %6 = tpu.matmul %4, %5, %cst {dimension_numbers = #tpu.dot_dimension_numbers<[1], [0], [0], [1], [0, 0, 1, 1], [], []>} : vector<16x2xf32>, vector<2x32xf32>, vector<16x32xf32> -> vector<16x32xf32>
    %7 = arith.addf %3, %6 : vector<16x32xf32>
    %c0_6 = arith.constant 0 : index
    %c0_7 = arith.constant 0 : index
    %8 = vector.load %arg7[%c0_6, %c0_7] : memref<16x32xf32, #tpu.memory_space<vmem>>, vector<16x32xf32>
    tpu.vector_store %arg7[%c0_6, %c0_7], %7 {strides = array<i32>} : memref<16x32xf32, #tpu.memory_space<vmem>>, vector<16x32xf32>,
    %c0_i32_8 = arith.constant 0 : i32
    %9 = arith.cmpi eq, %arg2, %c0_i32_8 : i32
    %10 = arith.extui %9 : i1 to i32
    %c0_i32_9 = arith.constant 0 : i32
    %11 = arith.cmpi ne, %10, %c0_i32_9 : i32
    scf.if %11 {
      %c0_10 = arith.constant 0 : index
      %c0_11 = arith.constant 0 : index
      %12 = vector.load %arg7[%c0_10, %c0_11] : memref<16x32xf32, #tpu.memory_space<vmem>>, vector<16x32xf32>
      %c0_12 = arith.constant 0 : index
      %c0_13 = arith.constant 0 : index
      %13 = vector.load %arg5[%c0_12, %c0_13] : memref<1x32xf32, #tpu.memory_space<vmem>>, vector<1x32xf32>
      %14 = vector.broadcast %13 : vector<1x32xf32> to vector<16x32xf32>
      %15 = arith.addf %12, %14 : vector<16x32xf32>
      %cst_14 = arith.constant 0.000000e+00 : f32
      %16 = vector.broadcast %cst_14 : f32 to vector<16x32xf32>
      %17 = arith.maximumf %15, %16 : vector<16x32xf32>
      %18 = math.absf %15 : vector<16x32xf32>
      %cst_15 = arith.constant 0.000000e+00 : f32
      %19 = vector.broadcast %cst_15 : f32 to vector<16x32xf32>
      %20 = arith.subf %19, %18 : vector<16x32xf32>
      %21 = math.exp %20 : vector<16x32xf32>
      %cst_16 = arith.constant 1.000000e+00 : f32
      %22 = vector.broadcast %cst_16 : f32 to vector<16x32xf32>
      %23 = arith.addf %22, %21 : vector<16x32xf32>
      %24 = math.log %23 : vector<16x32xf32>
      %25 = arith.addf %17, %24 : vector<16x32xf32>
      %c0_17 = arith.constant 0 : index
      %c0_18 = arith.constant 0 : index
      %26 = vector.load %arg6[%c0_17, %c0_18] : memref<16x32xf32, #tpu.memory_space<vmem>>, vector<16x32xf32>
      tpu.vector_store %arg6[%c0_17, %c0_18], %25 {strides = array<i32>} : memref<16x32xf32, #tpu.memory_space<vmem>>, vector<16x32xf32>,
    } else {
    }
    return
  }
  func.func @transform_0(%arg0: i32, %arg1: i32, %arg2: i32) -> (i32, i32) {
    %c0_i32 = arith.constant 0 : i32
    return %arg0, %arg2 : i32, i32
  }
  func.func @transform_1(%arg0: i32, %arg1: i32, %arg2: i32) -> (i32, i32) {
    %c0_i32 = arith.constant 0 : i32
    return %arg2, %arg1 : i32, i32
  }
  func.func @transform_2(%arg0: i32, %arg1: i32, %arg2: i32) -> (i32, i32) {
    %c0_i32 = arith.constant 0 : i32
    %c0_i32_0 = arith.constant 0 : i32
    return %c0_i32, %arg1 : i32, i32
  }
  func.func @transform_3(%arg0: i32, %arg1: i32, %arg2: i32) -> (i32, i32) {
    %c0_i32 = arith.constant 0 : i32
    return %arg0, %arg1 : i32, i32
  }
}

module attributes {stable_mosaic.version = 11 : i64} {
  func.func @_ssm_scan_kernel(%arg0: i32, %arg1: i32, %arg2: memref<1x8x32xf32, #tpu.memory_space<vmem>>, %arg3: memref<1x8x32xf32, #tpu.memory_space<vmem>>, %arg4: memref<1x8x16xf32, #tpu.memory_space<vmem>>, %arg5: memref<16x32xf32, #tpu.memory_space<vmem>>, %arg6: memref<1x8x32xf32, #tpu.memory_space<vmem>>, %arg7: memref<16x32xf32, #tpu.memory_space<vmem>>) attributes {dimension_semantics = [#tpu.dimension_semantics<parallel>, #tpu.dimension_semantics<parallel>], iteration_bounds = array<i64: 2, 1>, scalar_prefetch = 0 : i64, scratch_operands = 1 : i64, tpu.core_type = #tpu.core_type<tc>, window_params = [{transform_indices = @transform_0, window_bounds = array<i64: 1, 8, 32>}, {transform_indices = @transform_1, window_bounds = array<i64: 1, 8, 32>}, {transform_indices = @transform_2, window_bounds = array<i64: 1, 8, 16>}, {transform_indices = @transform_3, window_bounds = array<i64: 16, 32>}, {transform_indices = @transform_4, window_bounds = array<i64: 1, 8, 32>}]} {
    %c0 = arith.constant 0 : index
    %c0_0 = arith.constant 0 : index
    %0 = vector.load %arg5[%c0, %c0_0] : memref<16x32xf32, #tpu.memory_space<vmem>>, vector<16x32xf32>
    %cst = arith.constant 0.000000e+00 : f32
    %1 = vector.broadcast %cst : f32 to vector<16x32xf32>
    %c0_1 = arith.constant 0 : index
    %c0_2 = arith.constant 0 : index
    %2 = vector.load %arg7[%c0_1, %c0_2] : memref<16x32xf32, #tpu.memory_space<vmem>>, vector<16x32xf32>
    tpu.vector_store %arg7[%c0_1, %c0_2], %1 {strides = array<i32>} : memref<16x32xf32, #tpu.memory_space<vmem>>, vector<16x32xf32>,
    %c0_i32 = arith.constant 0 : i32
    %c8_i32 = arith.constant 8 : i32
    %3 = arith.addi %c0_i32, %c8_i32 : i32
    %c1_i32 = arith.constant 1 : i32
    scf.for %arg8 = %c0_i32 to %3 step %c1_i32  : i32 {
      %c1_i32_4 = arith.constant 1 : i32
      %4 = arith.subi %arg8, %c1_i32_4 : i32
      %c0_i32_5 = arith.constant 0 : i32
      %5 = arith.maxsi %4, %c0_i32_5 : i32
      %c0_6 = arith.constant 0 : index
      %6 = arith.index_cast %5 : i32 to index
      %c0_7 = arith.constant 0 : index
      %7 = vector.load %arg2[%c0_6, %6, %c0_7] : memref<1x8x32xf32, #tpu.memory_space<vmem>>, vector<1x1x32xf32>
      %8 = vector.shape_cast %7 : vector<1x1x32xf32> to vector<1x32xf32>
      %c0_8 = arith.constant 0 : index
      %9 = arith.index_cast %5 : i32 to index
      %c0_9 = arith.constant 0 : index
      %10 = vector.load %arg3[%c0_8, %9, %c0_9] : memref<1x8x32xf32, #tpu.memory_space<vmem>>, vector<1x1x32xf32>
      %11 = vector.shape_cast %10 : vector<1x1x32xf32> to vector<1x32xf32>
      %12 = vector.broadcast %8 : vector<1x32xf32> to vector<16x32xf32>
      %13 = arith.mulf %12, %0 : vector<16x32xf32>
      %14 = math.exp %13 : vector<16x32xf32>
      %15 = math.absf %0 : vector<16x32xf32>
      %cst_10 = arith.constant 9.99999974E-6 : f32
      %16 = vector.broadcast %cst_10 : f32 to vector<16x32xf32>
      %17 = arith.cmpf olt, %15, %16 : vector<16x32xf32>
      %cst_11 = arith.constant 1.000000e+00 : f32
      %18 = vector.broadcast %cst_11 : f32 to vector<16x32xf32>
      %19 = arith.subf %14, %18 : vector<16x32xf32>
      %cst_12 = arith.constant 1.000000e-10 : f32
      %20 = vector.broadcast %cst_12 : f32 to vector<16x32xf32>
      %21 = arith.addf %0, %20 : vector<16x32xf32>
      %22 = arith.divf %19, %21 : vector<16x32xf32>
      %23 = vector.shape_cast %8 : vector<1x32xf32> to vector<1x32xf32>
      %24 = vector.broadcast %23 : vector<1x32xf32> to vector<16x32xf32>
      %25 = arith.select %17, %24, %22 : vector<16x32xi1>, vector<16x32xf32>
      %c0_13 = arith.constant 0 : index
      %c0_14 = arith.constant 0 : index
      %26 = vector.load %arg7[%c0_13, %c0_14] : memref<16x32xf32, #tpu.memory_space<vmem>>, vector<16x32xf32>
      %27 = arith.mulf %14, %26 : vector<16x32xf32>
      %28 = vector.broadcast %11 : vector<1x32xf32> to vector<16x32xf32>
      %29 = arith.mulf %25, %28 : vector<16x32xf32>
      %30 = arith.addf %27, %29 : vector<16x32xf32>
      %c0_15 = arith.constant 0 : index
      %c0_16 = arith.constant 0 : index
      %31 = vector.load %arg7[%c0_15, %c0_16] : memref<16x32xf32, #tpu.memory_space<vmem>>, vector<16x32xf32>
      tpu.vector_store %arg7[%c0_15, %c0_16], %30 {strides = array<i32>} : memref<16x32xf32, #tpu.memory_space<vmem>>, vector<16x32xf32>,
      %c0_17 = arith.constant 0 : index
      %32 = arith.index_cast %arg8 : i32 to index
      %c0_18 = arith.constant 0 : index
      %33 = vector.load %arg4[%c0_17, %32, %c0_18] : memref<1x8x16xf32, #tpu.memory_space<vmem>>, vector<1x1x16xf32>
      %34 = vector.shape_cast %33 : vector<1x1x16xf32> to vector<1x16xf32>
      %cst_19 = arith.constant dense<0.000000e+00> : vector<1x32xf32>
      %35 = tpu.matmul %34, %30, %cst_19 {dimension_numbers = #tpu.dot_dimension_numbers<[1], [0], [0], [1], [0, 0, 1, 1], [], []>} : vector<1x16xf32>, vector<16x32xf32>, vector<1x32xf32> -> vector<1x32xf32>
      %c0_20 = arith.constant 0 : index
      %36 = arith.index_cast %arg8 : i32 to index
      %c0_21 = arith.constant 0 : index
      %37 = vector.load %arg6[%c0_20, %36, %c0_21] : memref<1x8x32xf32, #tpu.memory_space<vmem>>, vector<1x1x32xf32>
      %38 = vector.shape_cast %37 : vector<1x1x32xf32> to vector<1x32xf32>
      %39 = vector.shape_cast %35 : vector<1x32xf32> to vector<1x1x32xf32>
      tpu.vector_store %arg6[%c0_20, %36, %c0_21], %39 {strides = array<i32>} : memref<1x8x32xf32, #tpu.memory_space<vmem>>, vector<1x1x32xf32>,
    }
    %c8_i32_3 = arith.constant 8 : i32
    return
  }
  func.func @transform_0(%arg0: i32, %arg1: i32) -> (i32, i32, i32) {
    %c0_i32 = arith.constant 0 : i32
    %c0_i32_0 = arith.constant 0 : i32
    return %arg0, %c0_i32, %arg1 : i32, i32, i32
  }
  func.func @transform_1(%arg0: i32, %arg1: i32) -> (i32, i32, i32) {
    %c0_i32 = arith.constant 0 : i32
    %c0_i32_0 = arith.constant 0 : i32
    return %arg0, %c0_i32, %arg1 : i32, i32, i32
  }
  func.func @transform_2(%arg0: i32, %arg1: i32) -> (i32, i32, i32) {
    %c0_i32 = arith.constant 0 : i32
    %c0_i32_0 = arith.constant 0 : i32
    %c0_i32_1 = arith.constant 0 : i32
    return %arg0, %c0_i32, %c0_i32_0 : i32, i32, i32
  }
  func.func @transform_3(%arg0: i32, %arg1: i32) -> (i32, i32) {
    %c0_i32 = arith.constant 0 : i32
    %c0_i32_0 = arith.constant 0 : i32
    return %c0_i32, %arg1 : i32, i32
  }
  func.func @transform_4(%arg0: i32, %arg1: i32) -> (i32, i32, i32) {
    %c0_i32 = arith.constant 0 : i32
    %c0_i32_0 = arith.constant 0 : i32
    return %arg0, %c0_i32, %arg1 : i32, i32, i32
  }
}

module attributes {stable_mosaic.version = 11 : i64} {
  func.func @_linear_kernel(%arg0: i32, %arg1: i32, %arg2: i32, %arg3: memref<16x32xf32, #tpu.memory_space<vmem>>, %arg4: memref<32x32xf32, #tpu.memory_space<vmem>>, %arg5: memref<16x32xf32, #tpu.memory_space<vmem>>, %arg6: memref<16x32xf32, #tpu.memory_space<vmem>>) attributes {dimension_semantics = [#tpu.dimension_semantics<parallel>, #tpu.dimension_semantics<parallel>, #tpu.dimension_semantics<arbitrary>], iteration_bounds = array<i64: 1, 1, 1>, scalar_prefetch = 0 : i64, scratch_operands = 1 : i64, tpu.core_type = #tpu.core_type<tc>, window_params = [{transform_indices = @transform_0, window_bounds = array<i64: 16, 32>}, {transform_indices = @transform_1, window_bounds = array<i64: 32, 32>}, {transform_indices = @transform_2, window_bounds = array<i64: 16, 32>}]} {
    %c0_i32 = arith.constant 0 : i32
    %0 = arith.cmpi eq, %arg2, %c0_i32 : i32
    %1 = arith.extui %0 : i1 to i32
    %c0_i32_0 = arith.constant 0 : i32
    %2 = arith.cmpi ne, %1, %c0_i32_0 : i32
    scf.if %2 {
      %cst_10 = arith.constant 0.000000e+00 : f32
      %12 = vector.broadcast %cst_10 : f32 to vector<16x32xf32>
      %c0_11 = arith.constant 0 : index
      %c0_12 = arith.constant 0 : index
      %13 = vector.load %arg6[%c0_11, %c0_12] : memref<16x32xf32, #tpu.memory_space<vmem>>, vector<16x32xf32>
      tpu.vector_store %arg6[%c0_11, %c0_12], %12 {strides = array<i32>} : memref<16x32xf32, #tpu.memory_space<vmem>>, vector<16x32xf32>,
    } else {
    }
    %c0 = arith.constant 0 : index
    %c0_1 = arith.constant 0 : index
    %3 = vector.load %arg6[%c0, %c0_1] : memref<16x32xf32, #tpu.memory_space<vmem>>, vector<16x32xf32>
    %c0_2 = arith.constant 0 : index
    %c0_3 = arith.constant 0 : index
    %4 = vector.load %arg3[%c0_2, %c0_3] : memref<16x32xf32, #tpu.memory_space<vmem>>, vector<16x32xf32>
    %c0_4 = arith.constant 0 : index
    %c0_5 = arith.constant 0 : index
    %5 = vector.load %arg4[%c0_4, %c0_5] : memref<32x32xf32, #tpu.memory_space<vmem>>, vector<32x32xf32>
    %cst = arith.constant dense<0.000000e+00> : vector<16x32xf32>
    %6 = tpu.matmul %4, %5, %cst {dimension_numbers = #tpu.dot_dimension_numbers<[1], [0], [0], [1], [0, 0, 1, 1], [], []>} : vector<16x32xf32>, vector<32x32xf32>, vector<16x32xf32> -> vector<16x32xf32>
    %7 = arith.addf %3, %6 : vector<16x32xf32>
    %c0_6 = arith.constant 0 : index
    %c0_7 = arith.constant 0 : index
    %8 = vector.load %arg6[%c0_6, %c0_7] : memref<16x32xf32, #tpu.memory_space<vmem>>, vector<16x32xf32>
    tpu.vector_store %arg6[%c0_6, %c0_7], %7 {strides = array<i32>} : memref<16x32xf32, #tpu.memory_space<vmem>>, vector<16x32xf32>,
    %c0_i32_8 = arith.constant 0 : i32
    %9 = arith.cmpi eq, %arg2, %c0_i32_8 : i32
    %10 = arith.extui %9 : i1 to i32
    %c0_i32_9 = arith.constant 0 : i32
    %11 = arith.cmpi ne, %10, %c0_i32_9 : i32
    scf.if %11 {
      %c0_10 = arith.constant 0 : index
      %c0_11 = arith.constant 0 : index
      %12 = vector.load %arg6[%c0_10, %c0_11] : memref<16x32xf32, #tpu.memory_space<vmem>>, vector<16x32xf32>
      %c0_12 = arith.constant 0 : index
      %c0_13 = arith.constant 0 : index
      %13 = vector.load %arg5[%c0_12, %c0_13] : memref<16x32xf32, #tpu.memory_space<vmem>>, vector<16x32xf32>
      tpu.vector_store %arg5[%c0_12, %c0_13], %12 {strides = array<i32>} : memref<16x32xf32, #tpu.memory_space<vmem>>, vector<16x32xf32>,
    } else {
    }
    return
  }
  func.func @transform_0(%arg0: i32, %arg1: i32, %arg2: i32) -> (i32, i32) {
    %c0_i32 = arith.constant 0 : i32
    return %arg0, %arg2 : i32, i32
  }
  func.func @transform_1(%arg0: i32, %arg1: i32, %arg2: i32) -> (i32, i32) {
    %c0_i32 = arith.constant 0 : i32
    return %arg2, %arg1 : i32, i32
  }
  func.func @transform_2(%arg0: i32, %arg1: i32, %arg2: i32) -> (i32, i32) {
    %c0_i32 = arith.constant 0 : i32
    return %arg0, %arg1 : i32, i32
  }
}

module attributes {stable_mosaic.version = 11 : i64} {
  func.func @_linear_kernel(%arg0: i32, %arg1: i32, %arg2: i32, %arg3: memref<16x32xf32, #tpu.memory_space<vmem>>, %arg4: memref<32x32xf32, #tpu.memory_space<vmem>>, %arg5: memref<16x32xf32, #tpu.memory_space<vmem>>, %arg6: memref<16x32xf32, #tpu.memory_space<vmem>>, %arg7: memref<16x32xf32, #tpu.memory_space<vmem>>) attributes {dimension_semantics = [#tpu.dimension_semantics<parallel>, #tpu.dimension_semantics<parallel>, #tpu.dimension_semantics<arbitrary>], iteration_bounds = array<i64: 1, 1, 1>, scalar_prefetch = 0 : i64, scratch_operands = 1 : i64, tpu.core_type = #tpu.core_type<tc>, window_params = [{transform_indices = @transform_0, window_bounds = array<i64: 16, 32>}, {transform_indices = @transform_1, window_bounds = array<i64: 32, 32>}, {transform_indices = @transform_2, window_bounds = array<i64: 16, 32>}, {transform_indices = @transform_3, window_bounds = array<i64: 16, 32>}]} {
    %c0_i32 = arith.constant 0 : i32
    %0 = arith.cmpi eq, %arg2, %c0_i32 : i32
    %1 = arith.extui %0 : i1 to i32
    %c0_i32_0 = arith.constant 0 : i32
    %2 = arith.cmpi ne, %1, %c0_i32_0 : i32
    scf.if %2 {
      %cst_10 = arith.constant 0.000000e+00 : f32
      %12 = vector.broadcast %cst_10 : f32 to vector<16x32xf32>
      %c0_11 = arith.constant 0 : index
      %c0_12 = arith.constant 0 : index
      %13 = vector.load %arg7[%c0_11, %c0_12] : memref<16x32xf32, #tpu.memory_space<vmem>>, vector<16x32xf32>
      tpu.vector_store %arg7[%c0_11, %c0_12], %12 {strides = array<i32>} : memref<16x32xf32, #tpu.memory_space<vmem>>, vector<16x32xf32>,
    } else {
    }
    %c0 = arith.constant 0 : index
    %c0_1 = arith.constant 0 : index
    %3 = vector.load %arg7[%c0, %c0_1] : memref<16x32xf32, #tpu.memory_space<vmem>>, vector<16x32xf32>
    %c0_2 = arith.constant 0 : index
    %c0_3 = arith.constant 0 : index
    %4 = vector.load %arg3[%c0_2, %c0_3] : memref<16x32xf32, #tpu.memory_space<vmem>>, vector<16x32xf32>
    %c0_4 = arith.constant 0 : index
    %c0_5 = arith.constant 0 : index
    %5 = vector.load %arg4[%c0_4, %c0_5] : memref<32x32xf32, #tpu.memory_space<vmem>>, vector<32x32xf32>
    %cst = arith.constant dense<0.000000e+00> : vector<16x32xf32>
    %6 = tpu.matmul %4, %5, %cst {dimension_numbers = #tpu.dot_dimension_numbers<[1], [0], [0], [1], [0, 0, 1, 1], [], []>} : vector<16x32xf32>, vector<32x32xf32>, vector<16x32xf32> -> vector<16x32xf32>
    %7 = arith.addf %3, %6 : vector<16x32xf32>
    %c0_6 = arith.constant 0 : index
    %c0_7 = arith.constant 0 : index
    %8 = vector.load %arg7[%c0_6, %c0_7] : memref<16x32xf32, #tpu.memory_space<vmem>>, vector<16x32xf32>
    tpu.vector_store %arg7[%c0_6, %c0_7], %7 {strides = array<i32>} : memref<16x32xf32, #tpu.memory_space<vmem>>, vector<16x32xf32>,
    %c0_i32_8 = arith.constant 0 : i32
    %9 = arith.cmpi eq, %arg2, %c0_i32_8 : i32
    %10 = arith.extui %9 : i1 to i32
    %c0_i32_9 = arith.constant 0 : i32
    %11 = arith.cmpi ne, %10, %c0_i32_9 : i32
    scf.if %11 {
      %c0_10 = arith.constant 0 : index
      %c0_11 = arith.constant 0 : index
      %12 = vector.load %arg7[%c0_10, %c0_11] : memref<16x32xf32, #tpu.memory_space<vmem>>, vector<16x32xf32>
      %c0_12 = arith.constant 0 : index
      %c0_13 = arith.constant 0 : index
      %13 = vector.load %arg5[%c0_12, %c0_13] : memref<16x32xf32, #tpu.memory_space<vmem>>, vector<16x32xf32>
      %14 = arith.addf %12, %13 : vector<16x32xf32>
      %c0_14 = arith.constant 0 : index
      %c0_15 = arith.constant 0 : index
      %15 = vector.load %arg6[%c0_14, %c0_15] : memref<16x32xf32, #tpu.memory_space<vmem>>, vector<16x32xf32>
      tpu.vector_store %arg6[%c0_14, %c0_15], %14 {strides = array<i32>} : memref<16x32xf32, #tpu.memory_space<vmem>>, vector<16x32xf32>,
    } else {
    }
    return
  }
  func.func @transform_0(%arg0: i32, %arg1: i32, %arg2: i32) -> (i32, i32) {
    %c0_i32 = arith.constant 0 : i32
    return %arg0, %arg2 : i32, i32
  }
  func.func @transform_1(%arg0: i32, %arg1: i32, %arg2: i32) -> (i32, i32) {
    %c0_i32 = arith.constant 0 : i32
    return %arg2, %arg1 : i32, i32
  }
  func.func @transform_2(%arg0: i32, %arg1: i32, %arg2: i32) -> (i32, i32) {
    %c0_i32 = arith.constant 0 : i32
    return %arg0, %arg1 : i32, i32
  }
  func.func @transform_3(%arg0: i32, %arg1: i32, %arg2: i32) -> (i32, i32) {
    %c0_i32 = arith.constant 0 : i32
    return %arg0, %arg1 : i32, i32
  }
}

module attributes {stable_mosaic.version = 11 : i64} {
  func.func @_gate_kernel(%arg0: i32, %arg1: memref<16x32xf32, #tpu.memory_space<vmem>>, %arg2: memref<16x32xf32, #tpu.memory_space<vmem>>, %arg3: memref<16x32xf32, #tpu.memory_space<vmem>>, %arg4: memref<1x32xf32, #tpu.memory_space<vmem>>, %arg5: memref<16x32xf32, #tpu.memory_space<vmem>>) attributes {dimension_semantics = [#tpu.dimension_semantics<parallel>], iteration_bounds = array<i64: 1>, scalar_prefetch = 0 : i64, scratch_operands = 0 : i64, tpu.core_type = #tpu.core_type<tc>, window_params = [{transform_indices = @transform_0, window_bounds = array<i64: 16, 32>}, {transform_indices = @transform_1, window_bounds = array<i64: 16, 32>}, {transform_indices = @transform_2, window_bounds = array<i64: 16, 32>}, {pipeline_mode = #tpu.pipeline_mode<synchronous>, transform_indices = @transform_3, window_bounds = array<i64: 1, 32>}, {transform_indices = @transform_4, window_bounds = array<i64: 16, 32>}]} {
    %c0 = arith.constant 0 : index
    %c0_0 = arith.constant 0 : index
    %0 = vector.load %arg3[%c0, %c0_0] : memref<16x32xf32, #tpu.memory_space<vmem>>, vector<16x32xf32>
    %c0_1 = arith.constant 0 : index
    %c0_2 = arith.constant 0 : index
    %1 = vector.load %arg1[%c0_1, %c0_2] : memref<16x32xf32, #tpu.memory_space<vmem>>, vector<16x32xf32>
    %c0_3 = arith.constant 0 : index
    %c0_4 = arith.constant 0 : index
    %2 = vector.load %arg2[%c0_3, %c0_4] : memref<16x32xf32, #tpu.memory_space<vmem>>, vector<16x32xf32>
    %c0_5 = arith.constant 0 : index
    %c0_6 = arith.constant 0 : index
    %3 = vector.load %arg4[%c0_5, %c0_6] : memref<1x32xf32, #tpu.memory_space<vmem>>, vector<1x32xf32>
    %4 = vector.broadcast %3 : vector<1x32xf32> to vector<16x32xf32>
    %5 = arith.mulf %2, %4 : vector<16x32xf32>
    %6 = arith.addf %1, %5 : vector<16x32xf32>
    %cst = arith.constant 0.000000e+00 : f32
    %7 = vector.broadcast %cst : f32 to vector<16x32xf32>
    %8 = arith.subf %7, %0 : vector<16x32xf32>
    %9 = math.exp %8 : vector<16x32xf32>
    %cst_7 = arith.constant 1.000000e+00 : f32
    %10 = vector.broadcast %cst_7 : f32 to vector<16x32xf32>
    %11 = arith.addf %10, %9 : vector<16x32xf32>
    %cst_8 = arith.constant 1.000000e+00 : f32
    %12 = vector.broadcast %cst_8 : f32 to vector<16x32xf32>
    %13 = arith.divf %12, %11 : vector<16x32xf32>
    %14 = arith.mulf %0, %13 : vector<16x32xf32>
    %15 = arith.mulf %6, %14 : vector<16x32xf32>
    %c0_9 = arith.constant 0 : index
    %c0_10 = arith.constant 0 : index
    %16 = vector.load %arg5[%c0_9, %c0_10] : memref<16x32xf32, #tpu.memory_space<vmem>>, vector<16x32xf32>
    tpu.vector_store %arg5[%c0_9, %c0_10], %15 {strides = array<i32>} : memref<16x32xf32, #tpu.memory_space<vmem>>, vector<16x32xf32>,
    return
  }
  func.func @transform_0(%arg0: i32) -> (i32, i32) {
    %c0_i32 = arith.constant 0 : i32
    %c0_i32_0 = arith.constant 0 : i32
    return %arg0, %c0_i32 : i32, i32
  }
  func.func @transform_1(%arg0: i32) -> (i32, i32) {
    %c0_i32 = arith.constant 0 : i32
    %c0_i32_0 = arith.constant 0 : i32
    return %arg0, %c0_i32 : i32, i32
  }
  func.func @transform_2(%arg0: i32) -> (i32, i32) {
    %c0_i32 = arith.constant 0 : i32
    %c0_i32_0 = arith.constant 0 : i32
    return %arg0, %c0_i32 : i32, i32
  }
  func.func @transform_3(%arg0: i32) -> (i32, i32) {
    %c0_i32 = arith.constant 0 : i32
    %c0_i32_0 = arith.constant 0 : i32
    %c0_i32_1 = arith.constant 0 : i32
    return %c0_i32, %c0_i32_0 : i32, i32
  }
  func.func @transform_4(%arg0: i32) -> (i32, i32) {
    %c0_i32 = arith.constant 0 : i32
    %c0_i32_0 = arith.constant 0 : i32
    return %arg0, %c0_i32 : i32, i32
  }
}

module attributes {stable_mosaic.version = 11 : i64} {
  func.func @_linear_kernel(%arg0: i32, %arg1: i32, %arg2: i32, %arg3: memref<16x32xf32, #tpu.memory_space<vmem>>, %arg4: memref<32x128xf32, #tpu.memory_space<vmem>>, %arg5: memref<1x128xf32, #tpu.memory_space<vmem>>, %arg6: memref<16x128xf32, #tpu.memory_space<vmem>>, %arg7: memref<16x128xf32, #tpu.memory_space<vmem>>) attributes {dimension_semantics = [#tpu.dimension_semantics<parallel>, #tpu.dimension_semantics<parallel>, #tpu.dimension_semantics<arbitrary>], iteration_bounds = array<i64: 1, 1, 1>, scalar_prefetch = 0 : i64, scratch_operands = 1 : i64, tpu.core_type = #tpu.core_type<tc>, window_params = [{transform_indices = @transform_0, window_bounds = array<i64: 16, 32>}, {transform_indices = @transform_1, window_bounds = array<i64: 32, 128>}, {transform_indices = @transform_2, window_bounds = array<i64: 1, 128>}, {transform_indices = @transform_3, window_bounds = array<i64: 16, 128>}]} {
    %c0_i32 = arith.constant 0 : i32
    %0 = arith.cmpi eq, %arg2, %c0_i32 : i32
    %1 = arith.extui %0 : i1 to i32
    %c0_i32_0 = arith.constant 0 : i32
    %2 = arith.cmpi ne, %1, %c0_i32_0 : i32
    scf.if %2 {
      %cst_10 = arith.constant 0.000000e+00 : f32
      %12 = vector.broadcast %cst_10 : f32 to vector<16x128xf32>
      %c0_11 = arith.constant 0 : index
      %c0_12 = arith.constant 0 : index
      %13 = vector.load %arg7[%c0_11, %c0_12] : memref<16x128xf32, #tpu.memory_space<vmem>>, vector<16x128xf32>
      tpu.vector_store %arg7[%c0_11, %c0_12], %12 {strides = array<i32>} : memref<16x128xf32, #tpu.memory_space<vmem>>, vector<16x128xf32>,
    } else {
    }
    %c0 = arith.constant 0 : index
    %c0_1 = arith.constant 0 : index
    %3 = vector.load %arg7[%c0, %c0_1] : memref<16x128xf32, #tpu.memory_space<vmem>>, vector<16x128xf32>
    %c0_2 = arith.constant 0 : index
    %c0_3 = arith.constant 0 : index
    %4 = vector.load %arg3[%c0_2, %c0_3] : memref<16x32xf32, #tpu.memory_space<vmem>>, vector<16x32xf32>
    %c0_4 = arith.constant 0 : index
    %c0_5 = arith.constant 0 : index
    %5 = vector.load %arg4[%c0_4, %c0_5] : memref<32x128xf32, #tpu.memory_space<vmem>>, vector<32x128xf32>
    %cst = arith.constant dense<0.000000e+00> : vector<16x128xf32>
    %6 = tpu.matmul %4, %5, %cst {dimension_numbers = #tpu.dot_dimension_numbers<[1], [0], [0], [1], [0, 0, 1, 1], [], []>} : vector<16x32xf32>, vector<32x128xf32>, vector<16x128xf32> -> vector<16x128xf32>
    %7 = arith.addf %3, %6 : vector<16x128xf32>
    %c0_6 = arith.constant 0 : index
    %c0_7 = arith.constant 0 : index
    %8 = vector.load %arg7[%c0_6, %c0_7] : memref<16x128xf32, #tpu.memory_space<vmem>>, vector<16x128xf32>
    tpu.vector_store %arg7[%c0_6, %c0_7], %7 {strides = array<i32>} : memref<16x128xf32, #tpu.memory_space<vmem>>, vector<16x128xf32>,
    %c0_i32_8 = arith.constant 0 : i32
    %9 = arith.cmpi eq, %arg2, %c0_i32_8 : i32
    %10 = arith.extui %9 : i1 to i32
    %c0_i32_9 = arith.constant 0 : i32
    %11 = arith.cmpi ne, %10, %c0_i32_9 : i32
    scf.if %11 {
      %c0_10 = arith.constant 0 : index
      %c0_11 = arith.constant 0 : index
      %12 = vector.load %arg7[%c0_10, %c0_11] : memref<16x128xf32, #tpu.memory_space<vmem>>, vector<16x128xf32>
      %c0_12 = arith.constant 0 : index
      %c0_13 = arith.constant 0 : index
      %13 = vector.load %arg5[%c0_12, %c0_13] : memref<1x128xf32, #tpu.memory_space<vmem>>, vector<1x128xf32>
      %14 = vector.broadcast %13 : vector<1x128xf32> to vector<16x128xf32>
      %15 = arith.addf %12, %14 : vector<16x128xf32>
      %cst_14 = arith.constant 5.000000e-01 : f32
      %16 = vector.broadcast %cst_14 : f32 to vector<16x128xf32>
      %17 = arith.mulf %16, %15 : vector<16x128xf32>
      %cst_15 = arith.constant 0.707106769 : f32
      %18 = vector.broadcast %cst_15 : f32 to vector<16x128xf32>
      %19 = arith.mulf %15, %18 : vector<16x128xf32>
      %20 = math.erf %19 : vector<16x128xf32>
      %cst_16 = arith.constant 1.000000e+00 : f32
      %21 = vector.broadcast %cst_16 : f32 to vector<16x128xf32>
      %22 = arith.addf %21, %20 : vector<16x128xf32>
      %23 = arith.mulf %17, %22 : vector<16x128xf32>
      %c0_17 = arith.constant 0 : index
      %c0_18 = arith.constant 0 : index
      %24 = vector.load %arg6[%c0_17, %c0_18] : memref<16x128xf32, #tpu.memory_space<vmem>>, vector<16x128xf32>
      tpu.vector_store %arg6[%c0_17, %c0_18], %23 {strides = array<i32>} : memref<16x128xf32, #tpu.memory_space<vmem>>, vector<16x128xf32>,
    } else {
    }
    return
  }
  func.func @transform_0(%arg0: i32, %arg1: i32, %arg2: i32) -> (i32, i32) {
    %c0_i32 = arith.constant 0 : i32
    return %arg0, %arg2 : i32, i32
  }
  func.func @transform_1(%arg0: i32, %arg1: i32, %arg2: i32) -> (i32, i32) {
    %c0_i32 = arith.constant 0 : i32
    return %arg2, %arg1 : i32, i32
  }
  func.func @transform_2(%arg0: i32, %arg1: i32, %arg2: i32) -> (i32, i32) {
    %c0_i32 = arith.constant 0 : i32
    %c0_i32_0 = arith.constant 0 : i32
    return %c0_i32, %arg1 : i32, i32
  }
  func.func @transform_3(%arg0: i32, %arg1: i32, %arg2: i32) -> (i32, i32) {
    %c0_i32 = arith.constant 0 : i32
    return %arg0, %arg1 : i32, i32
  }
}

module attributes {stable_mosaic.version = 11 : i64} {
  func.func @_linear_kernel(%arg0: i32, %arg1: i32, %arg2: i32, %arg3: memref<16x128xf32, #tpu.memory_space<vmem>>, %arg4: memref<128x32xf32, #tpu.memory_space<vmem>>, %arg5: memref<1x32xf32, #tpu.memory_space<vmem>>, %arg6: memref<16x32xf32, #tpu.memory_space<vmem>>, %arg7: memref<16x32xf32, #tpu.memory_space<vmem>>, %arg8: memref<16x32xf32, #tpu.memory_space<vmem>>) attributes {dimension_semantics = [#tpu.dimension_semantics<parallel>, #tpu.dimension_semantics<parallel>, #tpu.dimension_semantics<arbitrary>], iteration_bounds = array<i64: 1, 1, 1>, scalar_prefetch = 0 : i64, scratch_operands = 1 : i64, tpu.core_type = #tpu.core_type<tc>, window_params = [{transform_indices = @transform_0, window_bounds = array<i64: 16, 128>}, {transform_indices = @transform_1, window_bounds = array<i64: 128, 32>}, {transform_indices = @transform_2, window_bounds = array<i64: 1, 32>}, {transform_indices = @transform_3, window_bounds = array<i64: 16, 32>}, {transform_indices = @transform_4, window_bounds = array<i64: 16, 32>}]} {
    %c0_i32 = arith.constant 0 : i32
    %0 = arith.cmpi eq, %arg2, %c0_i32 : i32
    %1 = arith.extui %0 : i1 to i32
    %c0_i32_0 = arith.constant 0 : i32
    %2 = arith.cmpi ne, %1, %c0_i32_0 : i32
    scf.if %2 {
      %cst_10 = arith.constant 0.000000e+00 : f32
      %12 = vector.broadcast %cst_10 : f32 to vector<16x32xf32>
      %c0_11 = arith.constant 0 : index
      %c0_12 = arith.constant 0 : index
      %13 = vector.load %arg8[%c0_11, %c0_12] : memref<16x32xf32, #tpu.memory_space<vmem>>, vector<16x32xf32>
      tpu.vector_store %arg8[%c0_11, %c0_12], %12 {strides = array<i32>} : memref<16x32xf32, #tpu.memory_space<vmem>>, vector<16x32xf32>,
    } else {
    }
    %c0 = arith.constant 0 : index
    %c0_1 = arith.constant 0 : index
    %3 = vector.load %arg8[%c0, %c0_1] : memref<16x32xf32, #tpu.memory_space<vmem>>, vector<16x32xf32>
    %c0_2 = arith.constant 0 : index
    %c0_3 = arith.constant 0 : index
    %4 = vector.load %arg3[%c0_2, %c0_3] : memref<16x128xf32, #tpu.memory_space<vmem>>, vector<16x128xf32>
    %c0_4 = arith.constant 0 : index
    %c0_5 = arith.constant 0 : index
    %5 = vector.load %arg4[%c0_4, %c0_5] : memref<128x32xf32, #tpu.memory_space<vmem>>, vector<128x32xf32>
    %cst = arith.constant dense<0.000000e+00> : vector<16x32xf32>
    %6 = tpu.matmul %4, %5, %cst {dimension_numbers = #tpu.dot_dimension_numbers<[1], [0], [0], [1], [0, 0, 1, 1], [], []>} : vector<16x128xf32>, vector<128x32xf32>, vector<16x32xf32> -> vector<16x32xf32>
    %7 = arith.addf %3, %6 : vector<16x32xf32>
    %c0_6 = arith.constant 0 : index
    %c0_7 = arith.constant 0 : index
    %8 = vector.load %arg8[%c0_6, %c0_7] : memref<16x32xf32, #tpu.memory_space<vmem>>, vector<16x32xf32>
    tpu.vector_store %arg8[%c0_6, %c0_7], %7 {strides = array<i32>} : memref<16x32xf32, #tpu.memory_space<vmem>>, vector<16x32xf32>,
    %c0_i32_8 = arith.constant 0 : i32
    %9 = arith.cmpi eq, %arg2, %c0_i32_8 : i32
    %10 = arith.extui %9 : i1 to i32
    %c0_i32_9 = arith.constant 0 : i32
    %11 = arith.cmpi ne, %10, %c0_i32_9 : i32
    scf.if %11 {
      %c0_10 = arith.constant 0 : index
      %c0_11 = arith.constant 0 : index
      %12 = vector.load %arg8[%c0_10, %c0_11] : memref<16x32xf32, #tpu.memory_space<vmem>>, vector<16x32xf32>
      %c0_12 = arith.constant 0 : index
      %c0_13 = arith.constant 0 : index
      %13 = vector.load %arg5[%c0_12, %c0_13] : memref<1x32xf32, #tpu.memory_space<vmem>>, vector<1x32xf32>
      %14 = vector.broadcast %13 : vector<1x32xf32> to vector<16x32xf32>
      %15 = arith.addf %12, %14 : vector<16x32xf32>
      %c0_14 = arith.constant 0 : index
      %c0_15 = arith.constant 0 : index
      %16 = vector.load %arg6[%c0_14, %c0_15] : memref<16x32xf32, #tpu.memory_space<vmem>>, vector<16x32xf32>
      %17 = arith.addf %15, %16 : vector<16x32xf32>
      %c0_16 = arith.constant 0 : index
      %c0_17 = arith.constant 0 : index
      %18 = vector.load %arg7[%c0_16, %c0_17] : memref<16x32xf32, #tpu.memory_space<vmem>>, vector<16x32xf32>
      tpu.vector_store %arg7[%c0_16, %c0_17], %17 {strides = array<i32>} : memref<16x32xf32, #tpu.memory_space<vmem>>, vector<16x32xf32>,
    } else {
    }
    return
  }
  func.func @transform_0(%arg0: i32, %arg1: i32, %arg2: i32) -> (i32, i32) {
    %c0_i32 = arith.constant 0 : i32
    return %arg0, %arg2 : i32, i32
  }
  func.func @transform_1(%arg0: i32, %arg1: i32, %arg2: i32) -> (i32, i32) {
    %c0_i32 = arith.constant 0 : i32
    return %arg2, %arg1 : i32, i32
  }
  func.func @transform_2(%arg0: i32, %arg1: i32, %arg2: i32) -> (i32, i32) {
    %c0_i32 = arith.constant 0 : i32
    %c0_i32_0 = arith.constant 0 : i32
    return %c0_i32, %arg1 : i32, i32
  }
  func.func @transform_3(%arg0: i32, %arg1: i32, %arg2: i32) -> (i32, i32) {
    %c0_i32 = arith.constant 0 : i32
    return %arg0, %arg1 : i32, i32
  }
  func.func @transform_4(%arg0: i32, %arg1: i32, %arg2: i32) -> (i32, i32) {
    %c0_i32 = arith.constant 0 : i32
    return %arg0, %arg1 : i32, i32
  }
}

module attributes {stable_mosaic.version = 11 : i64} {
  func.func @_linear_kernel(%arg0: i32, %arg1: i32, %arg2: i32, %arg3: memref<16x32xf32, #tpu.memory_space<vmem>>, %arg4: memref<32x64xf32, #tpu.memory_space<vmem>>, %arg5: memref<1x64xf32, #tpu.memory_space<vmem>>, %arg6: memref<16x64xf32, #tpu.memory_space<vmem>>, %arg7: memref<16x64xf32, #tpu.memory_space<vmem>>) attributes {dimension_semantics = [#tpu.dimension_semantics<parallel>, #tpu.dimension_semantics<parallel>, #tpu.dimension_semantics<arbitrary>], iteration_bounds = array<i64: 1, 1, 1>, scalar_prefetch = 0 : i64, scratch_operands = 1 : i64, tpu.core_type = #tpu.core_type<tc>, window_params = [{transform_indices = @transform_0, window_bounds = array<i64: 16, 32>}, {transform_indices = @transform_1, window_bounds = array<i64: 32, 64>}, {transform_indices = @transform_2, window_bounds = array<i64: 1, 64>}, {transform_indices = @transform_3, window_bounds = array<i64: 16, 64>}]} {
    %c0_i32 = arith.constant 0 : i32
    %0 = arith.cmpi eq, %arg2, %c0_i32 : i32
    %1 = arith.extui %0 : i1 to i32
    %c0_i32_0 = arith.constant 0 : i32
    %2 = arith.cmpi ne, %1, %c0_i32_0 : i32
    scf.if %2 {
      %cst_10 = arith.constant 0.000000e+00 : f32
      %12 = vector.broadcast %cst_10 : f32 to vector<16x64xf32>
      %c0_11 = arith.constant 0 : index
      %c0_12 = arith.constant 0 : index
      %13 = vector.load %arg7[%c0_11, %c0_12] : memref<16x64xf32, #tpu.memory_space<vmem>>, vector<16x64xf32>
      tpu.vector_store %arg7[%c0_11, %c0_12], %12 {strides = array<i32>} : memref<16x64xf32, #tpu.memory_space<vmem>>, vector<16x64xf32>,
    } else {
    }
    %c0 = arith.constant 0 : index
    %c0_1 = arith.constant 0 : index
    %3 = vector.load %arg7[%c0, %c0_1] : memref<16x64xf32, #tpu.memory_space<vmem>>, vector<16x64xf32>
    %c0_2 = arith.constant 0 : index
    %c0_3 = arith.constant 0 : index
    %4 = vector.load %arg3[%c0_2, %c0_3] : memref<16x32xf32, #tpu.memory_space<vmem>>, vector<16x32xf32>
    %c0_4 = arith.constant 0 : index
    %c0_5 = arith.constant 0 : index
    %5 = vector.load %arg4[%c0_4, %c0_5] : memref<32x64xf32, #tpu.memory_space<vmem>>, vector<32x64xf32>
    %cst = arith.constant dense<0.000000e+00> : vector<16x64xf32>
    %6 = tpu.matmul %4, %5, %cst {dimension_numbers = #tpu.dot_dimension_numbers<[1], [0], [0], [1], [0, 0, 1, 1], [], []>} : vector<16x32xf32>, vector<32x64xf32>, vector<16x64xf32> -> vector<16x64xf32>
    %7 = arith.addf %3, %6 : vector<16x64xf32>
    %c0_6 = arith.constant 0 : index
    %c0_7 = arith.constant 0 : index
    %8 = vector.load %arg7[%c0_6, %c0_7] : memref<16x64xf32, #tpu.memory_space<vmem>>, vector<16x64xf32>
    tpu.vector_store %arg7[%c0_6, %c0_7], %7 {strides = array<i32>} : memref<16x64xf32, #tpu.memory_space<vmem>>, vector<16x64xf32>,
    %c0_i32_8 = arith.constant 0 : i32
    %9 = arith.cmpi eq, %arg2, %c0_i32_8 : i32
    %10 = arith.extui %9 : i1 to i32
    %c0_i32_9 = arith.constant 0 : i32
    %11 = arith.cmpi ne, %10, %c0_i32_9 : i32
    scf.if %11 {
      %c0_10 = arith.constant 0 : index
      %c0_11 = arith.constant 0 : index
      %12 = vector.load %arg7[%c0_10, %c0_11] : memref<16x64xf32, #tpu.memory_space<vmem>>, vector<16x64xf32>
      %c0_12 = arith.constant 0 : index
      %c0_13 = arith.constant 0 : index
      %13 = vector.load %arg5[%c0_12, %c0_13] : memref<1x64xf32, #tpu.memory_space<vmem>>, vector<1x64xf32>
      %14 = vector.broadcast %13 : vector<1x64xf32> to vector<16x64xf32>
      %15 = arith.addf %12, %14 : vector<16x64xf32>
      %c0_14 = arith.constant 0 : index
      %c0_15 = arith.constant 0 : index
      %16 = vector.load %arg6[%c0_14, %c0_15] : memref<16x64xf32, #tpu.memory_space<vmem>>, vector<16x64xf32>
      tpu.vector_store %arg6[%c0_14, %c0_15], %15 {strides = array<i32>} : memref<16x64xf32, #tpu.memory_space<vmem>>, vector<16x64xf32>,
    } else {
    }
    return
  }
  func.func @transform_0(%arg0: i32, %arg1: i32, %arg2: i32) -> (i32, i32) {
    %c0_i32 = arith.constant 0 : i32
    return %arg0, %arg2 : i32, i32
  }
  func.func @transform_1(%arg0: i32, %arg1: i32, %arg2: i32) -> (i32, i32) {
    %c0_i32 = arith.constant 0 : i32
    return %arg2, %arg1 : i32, i32
  }
  func.func @transform_2(%arg0: i32, %arg1: i32, %arg2: i32) -> (i32, i32) {
    %c0_i32 = arith.constant 0 : i32
    %c0_i32_0 = arith.constant 0 : i32
    return %c0_i32, %arg1 : i32, i32
  }
  func.func @transform_3(%arg0: i32, %arg1: i32, %arg2: i32) -> (i32, i32) {
    %c0_i32 = arith.constant 0 : i32
    return %arg0, %arg1 : i32, i32
  }
}

</mosaic_0001>

<bundles_post_ra>
// kernel: forward.28
= control target key start
LH: loop header
LB: loop body
LE: loop exit
PB: predicated region body
PF: predicated region fallthrough
CT: control target
= control target key end

     0   :  { %vm16_vm0 = vcmask 261120   ;;  %s118_s0 = inlined_call_operand.vmem [shape: f32[16,32], index: 0, kind: input, shape index: {}]   ;;  %s119_s1 = inlined_call_operand.vmem [shape: f32[1,32], index: 1, kind: input, shape index: {}]   ;;  %s120_s2 = inlined_call_operand.vmem [shape: f32[1,32], index: 2, kind: input, shape index: {}]   ;;  %s121_s3 = inlined_call_operand.vmem [shape: f32[16,32], index: 3, kind: output, shape index: {}]  }
   0x1   :  { %v14_v0 = vld [vmem:[%s118_s0] sm:$0xff]  ;;  %v15_v1 = vld [vmem:[%s118_s0 + $0x8] sm:$0xff] }
   0x2   :  { %v17_v2 = vsel %vm16_vm0, %v14_v0, 0.0  ;;  %v20_v3 = vsel %vm16_vm0, %v15_v1, 0.0  ;;  %v68_v21 = vld [vmem:[%s119_s1] ss:$0 sm:$0xff] }
   0x3   :  { %18 = vadd.xlane.f32.xlu0 %v17_v2  ;;  %v69_v23 = vld [vmem:[%s120_s2] ss:$0 sm:$0xff] }
   0x7   :  { %21 = vadd.xlane.f32.xlu0 %v20_v3 }
  0x8c   :  { %v19_v4 = vpop.xlane.xlu0 %18 }
  0x8d   :  { %v24_v5 = vmul.f32 0.03125, %v19_v4 }
  0x8f   :  { %v26_v6 = vsub.f32 %v14_v0, %v24_v5 }
  0x90   :  { %v22_v7 = vpop.xlane.xlu0 %21 }
  0x91   :  { %v25_v8 = vmul.f32 0.03125, %v22_v7  ;;  %v28_v9 = vmul.f32 %v26_v6, %v26_v6 }
  0x93   :  { %v27_v10 = vsub.f32 %v15_v1, %v25_v8  ;;  %v30_v11 = vsel %vm16_vm0, %v28_v9, 0.0 }
  0x94   :  { %31 = vadd.xlane.f32.xlu1 %v30_v11 }
  0x95   :  { %v29_v12 = vmul.f32 %v27_v10, %v27_v10 }
  0x97   :  { %v33_v13 = vsel %vm16_vm0, %v29_v12, 0.0 }
  0x98   :  { %34 = vadd.xlane.f32.xlu1 %v33_v13 }
 0x11d   :  { %v32_v14 = vpop.xlane.xlu1 %31 }
 0x11e   :  { %v36_v15 = vmul.f32 0.03125, %v32_v14 }
 0x120   :  { %v38_v16 = vadd.f32 1e-05, %v36_v15 }
 0x121   :  { %v35_v17 = vpop.xlane.xlu1 %34 }
 0x122   :  { %70 = vrsqrt.f32 %v38_v16  ;;  %v37_v18 = vmul.f32 0.03125, %v35_v17 }
 0x124   :  { %v39_v19 = vadd.f32 1e-05, %v37_v18 }
 0x126   :  { %72 = vrsqrt.f32 %v39_v19 }
 0x12f   :  { %v71_v20 = vpop.eup %70 }
 0x130   :  { %v42_v22 = vmul.f32 %v71_v20, %v26_v6 }
 0x132   :  { %v51_v24 = vmul.f32 %v68_v21, %v42_v22 }
 0x133   :  { %v73_v25 = vpop.eup %72 }
 0x134   :  { %v60_v26 = vadd.f32 %v69_v23, %v51_v24  ;;  %v43_v27 = vmul.f32 %v73_v25, %v27_v10 }
 0x136   :  { %62 = vst.msk [vmem:[%s121_s3] sm:$0xff] %vm16_vm0, %v60_v26  ;;  %v52_v28 = vmul.f32 %v68_v21, %v43_v27 }
 0x138   :  { %v61_v29 = vadd.f32 %v69_v23, %v52_v28 }
 0x13a   :  { %63 = vst.msk [vmem:[%s121_s3 + $0x8] sm:$0xff] %vm16_vm0, %v61_v29 }

// kernel: forward.26
= control target key start
LH: loop header
LB: loop body
LE: loop exit
PB: predicated region body
PF: predicated region fallthrough
CT: control target
= control target key end

     0   :  { %v149_v0 = vmov 0.0   ;;  %vm150_vm0 = vmmov 0   ;;  %vm25_vm1 = vcmask 261120   ;;  %s192_s1 = inlined_call_operand.vmem [shape: f32[32,128], index: 1, kind: input, shape index: {}]   ;;  %s193_s0 = inlined_call_operand.vmem [shape: f32[2,32], index: 0, kind: input, shape index: {}]   ;;  %s194_s2 = inlined_call_operand.vmem [shape: f32[1,128], index: 2, kind: input, shape index: {}]   ;;  %s195_s3 = inlined_call_operand.vmem [shape: f32[2,128], index: 3, kind: output, shape index: {}]  }
   0x1   :  { %132 = vmatprep.subr.mxu0 %v149_v0  ;;  %18 = vst [vmem:[#allocation2] sm:$0x3] %v149_v0  ;;  %v24_v1 = vld [vmem:[%s192_s1 + $0x18] sm:$0xff]  ;;  %v23_v2 = vld [vmem:[%s192_s1 + $0x10] sm:$0xff]  ;;  %140 = vmatprep.mubr.msk.f32.mxu0 %vm150_vm0, %v149_v0  ;;  %v22_v3 = vld [vmem:[%s192_s1 + $0x8] sm:$0xff] }
   0x2   :  { %133 = vmatpush3.msra.mxu0 %v24_v1  ;;  %v21_v4 = vld [vmem:[%s192_s1] sm:$0xff] }
   0x3   :  { %134 = vmatprep.subr.mxu0 %v149_v0  ;;  %v20_v5 = vld [vmem:[%s193_s0] sm:$0x3] }
   0x4   :  { %135 = vmatpush3.msra.mxu0 %v23_v2  ;;  %v126_v10 = vld [vmem:[%s194_s2] ss:$0 sm:$0xff] }
   0x5   :  { %136 = vmatprep.subr.mxu0 %v149_v0 }
   0x6   :  { %137 = vmatpush3.msra.mxu0 %v22_v3 }
   0x7   :  { %138 = vmatprep.subr.mxu0 %v149_v0 }
   0x8   :  { %139 = vmatpush3.msra.mxu0 %v21_v4  ;;  %v19_v6 = vld [vmem:[#allocation2] sm:$0x3] }
   0x9   :  { %141 = vmatmul.mubr.msk.f32.vlgmr.msra.gmra.mxu0 %vm25_vm1, %v20_v5 }
  0xc9   :  { %v95_v7 = vpop.f32.mrf.mxu0 }
  0xca   :  { %v99_v8 = vadd.f32 %v95_v7, %v19_v6 }
  0xcb   :  { %v142_v9 = vpop.f32.mrf.mxu0 }
  0xcc   :  { %100 = vst [vmem:[#allocation2] sm:$0x3] %v99_v8 }
  0xd3   :  { %v104_v11 = vld [vmem:[#allocation2] sm:$0x3] }
  0xd4   :  { %v112_v12 = vadd.f32 %v126_v10, %v104_v11 }
  0xd6   :  { %v113_v13 = vsub.f32 0.0, %v112_v12 }
  0xd8   :  { %v114_v14 = vmul.f32 1.442695, %v113_v13 }
  0xda   :  { %145 = vpow2.f32 %v114_v14 }
  0xe7   :  { %v146_v15 = vpop.eup %145 }
  0xe8   :  { %v116_v16 = vadd.f32 1.0, %v146_v15 }
  0xea   :  { %147 = vrcp.f32 %v116_v16 }
  0xf7   :  { %v148_v17 = vpop.eup %147 }
  0xf8   :  { %v119_v18 = vmul.f32 %v148_v17, %v112_v12 }
  0xfa   :  { %120 = vst [vmem:[%s195_s3] sm:$0x3] %v119_v18 }

// kernel: forward.30
= control target key start
LH: loop header
LB: loop body
LE: loop exit
PB: predicated region body
PF: predicated region fallthrough
CT: control target
= control target key end

     0   :  { %vm26_vm0 = vcmask 261120   ;;  %vm15_vm1 = vcmask 277504   ;;  %v144_v2 = vmov 0.0   ;;  %s192_s1 = inlined_call_operand.vmem [shape: f32[32,34], index: 1, kind: input, shape index: {}]   ;;  %s193_s0 = inlined_call_operand.vmem [shape: f32[16,32], index: 0, kind: input, shape index: {}]   ;;  %s194_s2 = inlined_call_operand.vmem [shape: f32[16,34], index: 2, kind: output, shape index: {}]  }
   0x1   :  { %v25_v0 = vld [vmem:[%s192_s1 + $0x18] sm:$0xff]  ;;  %v24_v1 = vld [vmem:[%s192_s1 + $0x10] sm:$0xff]  ;;  %17 = vst.msk [vmem:[#allocation2 + $0x8] sm:$0xff] %vm15_vm1, %v144_v2  ;;  %16 = vst.msk [vmem:[#allocation2] sm:$0xff] %vm15_vm1, %v144_v2 }
   0x2   :  { %132 = vmatprep.subr.mxu0 %v25_v0  ;;  %v20_v3 = vld [vmem:[%s193_s0] sm:$0xff]  ;;  %v23_v4 = vld [vmem:[%s192_s1 + $0x8] sm:$0xff] }
   0x3   :  { %133 = vmatpush3.msra.mxu0 %v25_v0  ;;  %140 = vmatprep.mubr.msk.f32.mxu0 %vm26_vm0, %v20_v3  ;;  %v22_v5 = vld [vmem:[%s192_s1] sm:$0xff]  ;;  %v21_v6 = vld [vmem:[%s193_s0 + $0x8] sm:$0xff] }
   0x4   :  { %134 = vmatprep.subr.mxu0 %v24_v1 }
   0x5   :  { %135 = vmatpush3.msra.mxu0 %v24_v1 }
   0x6   :  { %136 = vmatprep.subr.mxu0 %v23_v4 }
   0x7   :  { %137 = vmatpush3.msra.mxu0 %v23_v4 }
   0x8   :  { %138 = vmatprep.subr.mxu0 %v22_v5  ;;  %v19_v7 = vld [vmem:[#allocation2 + $0x8] sm:$0xff]  ;;  %v18_v9 = vld [vmem:[#allocation2] sm:$0xff] }
   0x9   :  { %139 = vmatpush3.msra.mxu0 %v22_v5 }
   0xa   :  { %141 = vmatmul.mubr.msk.f32.vlgmr.msra.gmra.mxu0 %vm26_vm0, %v21_v6 }
  0xca   :  { %v142_v8 = vpop.f32.mrf.mxu0 }
  0xcb   :  { %v109_v10 = vadd.f32 %v142_v8, %v19_v7 }
  0xcc   :  { %v99_v11 = vpop.f32.mrf.mxu0 }
  0xcd   :  { %112 = vst.msk [vmem:[#allocation2 + $0x8] sm:$0xff] %vm15_vm1, %v109_v10  ;;  %v108_v12 = vadd.f32 %v99_v11, %v18_v9 }
  0xcf   :  { %111 = vst.msk [vmem:[#allocation2] sm:$0xff] %vm15_vm1, %v108_v12 }
  0xd4   :  { %v117_v13 = vld [vmem:[#allocation2 + $0x8] sm:$0xff] }
  0xd5   :  { %119 = vst.msk [vmem:[%s194_s2 + $0x8] sm:$0xff] %vm15_vm1, %v117_v13 }
  0xd6   :  { %v116_v14 = vld [vmem:[#allocation2] sm:$0xff] }
  0xd7   :  { %118 = vst.msk [vmem:[%s194_s2] sm:$0xff] %vm15_vm1, %v116_v14 }

// kernel: forward.27
= control target key start
LH: loop header
LB: loop body
LE: loop exit
PB: predicated region body
PF: predicated region fallthrough
CT: control target
= control target key end

     0   :  { %vm18_vm0 = vcmask 254976   ;;  %v183_v0 = vmov 0.0   ;;  %vm184_vm1 = vmmov 0   ;;  %s265_s1 = inlined_call_operand.vmem [shape: f32[128,32], index: 1, kind: input, shape index: {}]   ;;  %s266_s0 = inlined_call_operand.vmem [shape: f32[2,128], index: 0, kind: input, shape index: {}]   ;;  %s267_s2 = inlined_call_operand.vmem [shape: f32[1,32], index: 2, kind: input, shape index: {}]   ;;  %s268_s3 = inlined_call_operand.vmem [shape: f32[2,32], index: 3, kind: output, shape index: {}]  }
   0x1   :  { %146 = vmatprep.subr.mxu0 %v183_v0  ;;  %v37_v1 = vld [vmem:[%s265_s1 + $0x78] sm:$0xff]  ;;  %v36_v2 = vld [vmem:[%s265_s1 + $0x70] sm:$0xff]  ;;  %178 = vmatprep.mubr.msk.f32.mxu0 %vm184_vm1, %v183_v0  ;;  %19 = vst.msk [vmem:[#allocation2] sm:$0x3] %vm18_vm0, %v183_v0  ;;  %v35_v3 = vld [vmem:[%s265_s1 + $0x68] sm:$0xff] }
   0x2   :  { %147 = vmatpush3.msra.mxu0 %v37_v1  ;;  %v34_v4 = vld [vmem:[%s265_s1 + $0x60] sm:$0xff]  ;;  %v33_v5 = vld [vmem:[%s265_s1 + $0x58] sm:$0xff]  ;;  %v32_v6 = vld [vmem:[%s265_s1 + $0x50] sm:$0xff] }
   0x3   :  { %148 = vmatprep.subr.mxu0 %v183_v0  ;;  %v31_v7 = vld [vmem:[%s265_s1 + $0x48] sm:$0xff]  ;;  %v30_v8 = vld [vmem:[%s265_s1 + $0x40] sm:$0xff]  ;;  %v29_v9 = vld [vmem:[%s265_s1 + $0x38] sm:$0xff] }
   0x4   :  { %149 = vmatpush3.msra.mxu0 %v36_v2  ;;  %v28_v10 = vld [vmem:[%s265_s1 + $0x30] sm:$0xff]  ;;  %v27_v11 = vld [vmem:[%s265_s1 + $0x28] sm:$0xff]  ;;  %v26_v12 = vld [vmem:[%s265_s1 + $0x20] sm:$0xff] }
   0x5   :  { %150 = vmatprep.subr.mxu0 %v183_v0  ;;  %v25_v13 = vld [vmem:[%s265_s1 + $0x18] sm:$0xff]  ;;  %v24_v14 = vld [vmem:[%s265_s1 + $0x10] sm:$0xff]  ;;  %v23_v15 = vld [vmem:[%s265_s1 + $0x8] sm:$0xff] }
   0x6   :  { %151 = vmatpush3.msra.mxu0 %v35_v3  ;;  %v22_v16 = vld [vmem:[%s265_s1] sm:$0xff] }
   0x7   :  { %152 = vmatprep.subr.mxu0 %v183_v0  ;;  %v21_v17 = vld [vmem:[%s266_s0] sm:$0x3] }
   0x8   :  { %153 = vmatpush3.msra.mxu0 %v34_v4  ;;  %v20_v18 = vld [vmem:[#allocation2] sm:$0x3] }
   0x9   :  { %154 = vmatprep.subr.mxu0 %v183_v0  ;;  %v128_v22 = vld [vmem:[%s267_s2] ss:$0 sm:$0xff] }
   0xa   :  { %155 = vmatpush3.msra.mxu0 %v33_v5 }
   0xb   :  { %156 = vmatprep.subr.mxu0 %v183_v0 }
   0xc   :  { %157 = vmatpush3.msra.mxu0 %v32_v6 }
   0xd   :  { %158 = vmatprep.subr.mxu0 %v183_v0 }
   0xe   :  { %159 = vmatpush3.msra.mxu0 %v31_v7 }
   0xf   :  { %160 = vmatprep.subr.mxu0 %v183_v0 }
  0x10   :  { %161 = vmatpush3.msra.mxu0 %v30_v8 }
  0x11   :  { %162 = vmatprep.subr.mxu0 %v183_v0 }
  0x12   :  { %163 = vmatpush3.msra.mxu0 %v29_v9 }
  0x13   :  { %164 = vmatprep.subr.mxu0 %v183_v0 }
  0x14   :  { %165 = vmatpush3.msra.mxu0 %v28_v10 }
  0x15   :  { %166 = vmatprep.subr.mxu0 %v183_v0 }
  0x16   :  { %167 = vmatpush3.msra.mxu0 %v27_v11 }
  0x17   :  { %168 = vmatprep.subr.mxu0 %v183_v0 }
  0x18   :  { %169 = vmatpush3.msra.mxu0 %v26_v12 }
  0x19   :  { %170 = vmatprep.subr.mxu0 %v183_v0 }
  0x1a   :  { %171 = vmatpush3.msra.mxu0 %v25_v13 }
  0x1b   :  { %172 = vmatprep.subr.mxu0 %v183_v0 }
  0x1c   :  { %173 = vmatpush3.msra.mxu0 %v24_v14 }
  0x1d   :  { %174 = vmatprep.subr.mxu0 %v183_v0 }
  0x1e   :  { %175 = vmatpush3.msra.mxu0 %v23_v15 }
  0x1f   :  { %176 = vmatprep.subr.mxu0 %v183_v0 }
  0x20   :  { %177 = vmatpush3.msra.mxu0 %v22_v16 }
  0x21   :  { %179 = vmatmul.mubr.f32.vlgmr.msra.gmra.mxu0 %v21_v17 }
  0xe1   :  { %v104_v19 = vpop.f32.mrf.mxu0 }
  0xe2   :  { %v108_v20 = vadd.f32 %v104_v19, %v20_v18 }
  0xe3   :  { %v180_v21 = vpop.f32.mrf.mxu0 }
  0xe4   :  { %110 = vst.msk [vmem:[#allocation2] sm:$0x3] %vm18_vm0, %v108_v20 }
  0xeb   :  { %v114_v23 = vld [vmem:[#allocation2] sm:$0x3] }
  0xec   :  { %v122_v24 = vadd.f32 %v128_v22, %v114_v23 }
  0xee   :  { %123 = vst.msk [vmem:[%s268_s3] sm:$0x3] %vm18_vm0, %v122_v24 }

// kernel: forward.32
= control target key start
LH: loop header
LB: loop body
LE: loop exit
PB: predicated region body
PF: predicated region fallthrough
CT: control target
= control target key end

     0   :  { %s408_s9 = smov 0   ;;  %s410_s10 = smov 0   ;;  %s460_s0 = inlined_call_operand.vmem [shape: f32[2,8,32], index: 0, kind: input, shape index: {}]   ;;  %s461_s1 = inlined_call_operand.vmem [shape: f32[4,32], index: 1, kind: input, shape index: {}]   ;;  %s462_s2 = inlined_call_operand.vmem [shape: f32[2,8,32], index: 2, kind: output, shape index: {}]  }
   0x1   :  { %s412_s11 = smov 0  }
   0x2 LB: > { %s24_s12 = sadd.s32 1, %s387_s10  ;;  %p332_p0 = scmp.ge.s32.totalorder %s391_s11, 1  ;;  %s391_s11 = sphi %s412_s11, %s12_s11   ;;  %s387_s10 = sphi %s410_s10, %s464_s10   ;;  %s383_s9 = sphi %s408_s9, %s463_s9  }
   0x3   : > { %p26_p1 = scmp.ge.s32.totalorder %s24_s12, 2  ;;  %p139_p2 = scmp.lt.s32.totalorder %s391_s11, 3 }
   0x5   : > { %s466_s12 = smov (%p26_p1, %s24_s12), 0  ;;  %p140_p3 = pnand %p332_p0, %p139_p2 }
   0x6   : > { %p169_p4 = scmp.lt.s32.totalorder (!%p140_p3), %s383_s9, 1 }
   0x7   : > { %143 = sbr.rel (%p140_p3) target bundleno = 64 (0x40), region = 28 }
   0xc   : > { %s468_s9 = smov (!%p169_p4, %s383_s9), 1  ;;  %v335_v0 = vld [vmem:[%s461_s1 + $0x3] ss:$0 sm:$0xff]  ;;  %vm197_vm0 = vcmask 1042432   ;;  %v336_v2 = vld [vmem:[%s461_s1] ss:$0 sm:$0xff] }
   0xd   : > { %s333_s13 = sshll.u32 %s468_s9, 3  ;;  %vm208_vm1 = vcmask 1041408   ;;  %vm219_vm2 = vcmask 1040384   ;;  %v337_v5 = vld [vmem:[%s461_s1 + $0x1] ss:$0 sm:$0xff]  ;;  %vm235_vm3 = vcmask 261120  }
   0xe   : > { %s175_s16 = scalar_lea.vmem %s460_s0, %s333_s13  ;;  %v338_v11 = vld [vmem:[%s461_s1 + $0x2] ss:$0 sm:$0xff]  ;;  %s186_s27 = scalar_lea.vmem %s462_s2, %s333_s13 }
   0xf   : > { %v187_v1 = vld [vmem:[%s175_s16] sm:$0xff] }
  0x10   : > { %v195_v3 = vrot.slane %v187_v1, 5  ;;  %v206_v4 = vrot.slane %v187_v1, 6  ;;  %v217_v6 = vrot.slane %v187_v1, 7  ;;  %v193_v7 = vmul.f32 %v335_v0, %v187_v1 }
  0x12   : > { %v198_v8 = vsel %vm197_vm0, 0.0, %v195_v3  ;;  %v209_v9 = vsel %vm208_vm1, 0.0, %v206_v4  ;;  %v220_v10 = vsel %vm219_vm2, 0.0, %v217_v6 }
  0x13   : > { %v204_v12 = vmul.f32 %v336_v2, %v198_v8  ;;  %v215_v13 = vmul.f32 %v337_v5, %v209_v9  ;;  %v226_v15 = vmul.f32 %v338_v11, %v220_v10 }
  0x15   : > { %v205_v14 = vadd.f32 %v204_v12, %v193_v7 }
  0x17   : > { %v216_v16 = vadd.f32 %v215_v13, %v205_v14 }
  0x19   : > { %v227_v17 = vadd.f32 %v226_v15, %v216_v16 }
  0x1b   : > { %v228_v18 = vsub.f32 0.0, %v227_v17 }
  0x1d   : > { %v229_v19 = vmul.f32 1.442695, %v228_v18 }
  0x1f   : > { %365 = vpow2.f32 %v229_v19 }
  0x2c   : > { %v366_v20 = vpop.eup %365 }
  0x2d   : > { %v231_v21 = vadd.f32 1.0, %v366_v20 }
  0x2f   : > { %367 = vrcp.f32 %v231_v21 }
  0x3c   : > { %v368_v22 = vpop.eup %367 }
  0x3d   : > { %v234_v23 = vmul.f32 %v368_v22, %v227_v17 }
  0x3f   : > { %236 = vst.msk [vmem:[%s186_s27] sm:$0xff] %vm235_vm3, %v234_v23 }
  0x40 PF: > { %s12_s11 = sadd.s32 1, %s391_s11   ;;  %s463_s9 = smov %s387_s10 }
  0x41   : > { %p9_p5 = scmp.ge.s32.totalorder %s12_s11, 4   ;;  %s464_s10 = smov %s466_s12 }
  0x43   :  { %11 = sbr.rel (!%p9_p5) target bundleno = 2 (0x2), region = 61 }

// kernel: forward.31
= control target key start
LH: loop header
LB: loop body
LE: loop exit
PB: predicated region body
PF: predicated region fallthrough
CT: control target
= control target key end

     0   :  { %vm33_vm0 = vcmask 1041408   ;;  %vm26_vm1 = vcmask 15360   ;;  %vm18_vm2 = vcmask 261120   ;;  %v176_v3 = vmov 0.0   ;;  %s221_s1 = inlined_call_operand.vmem [shape: f32[2,32], index: 1, kind: input, shape index: {}]   ;;  %s222_s0 = inlined_call_operand.vmem [shape: f32[16,2], index: 0, kind: input, shape index: {}]   ;;  %s223_s2 = inlined_call_operand.vmem [shape: f32[1,32], index: 2, kind: input, shape index: {}]   ;;  %s224_s3 = inlined_call_operand.vmem [shape: f32[16,32], index: 3, kind: output, shape index: {}]  }
   0x1   :  { %v25_v0 = vld [vmem:[%s221_s1] sm:$0x3]  ;;  %v24_v2 = vld [vmem:[%s222_s0 + $0x8] sm:$0xff]  ;;  %20 = vst.msk [vmem:[#allocation2 + $0x8] sm:$0xff] %vm18_vm2, %v176_v3  ;;  %19 = vst.msk [vmem:[#allocation2] sm:$0xff] %vm18_vm2, %v176_v3 }
   0x2   :  { %v23_v1 = vld [vmem:[%s222_s0] sm:$0xff]  ;;  %162 = vmatprep.subr.msk.mxu0 %vm33_vm0, %v25_v0 }
   0x3   :  { %164 = vmatprep.mubr.msk.f32.mxu0 %vm26_vm1, %v23_v1  ;;  %163 = vmatpush3.msk.msra.mxu0 %vm33_vm0, %v25_v0  ;;  %v158_v10 = vld [vmem:[%s223_s2] ss:$0 sm:$0xff] }
   0x4   :  { %165 = vmatmul.mubr.msk.f32.vlgmr.msra.gmra.mxu0 %vm26_vm1, %v24_v2 }
   0x8   :  { %v22_v4 = vld [vmem:[#allocation2 + $0x8] sm:$0xff]  ;;  %v21_v6 = vld [vmem:[#allocation2] sm:$0xff] }
  0xc4   :  { %v166_v5 = vpop.f32.mrf.mxu0 }
  0xc5   :  { %v113_v7 = vadd.f32 %v166_v5, %v22_v4 }
  0xc6   :  { %v103_v8 = vpop.f32.mrf.mxu0 }
  0xc7   :  { %116 = vst.msk [vmem:[#allocation2 + $0x8] sm:$0xff] %vm18_vm2, %v113_v7  ;;  %v112_v9 = vadd.f32 %v103_v8, %v21_v6 }
  0xc9   :  { %115 = vst.msk [vmem:[#allocation2] sm:$0xff] %vm18_vm2, %v112_v9 }
  0xce   :  { %v121_v11 = vld [vmem:[#allocation2 + $0x8] sm:$0xff] }
  0xcf   :  { %v130_v12 = vadd.f32 %v158_v10, %v121_v11 }
  0xd0   :  { %v120_v13 = vld [vmem:[#allocation2] sm:$0xff] }
  0xd1   :  { %v134_v14 = vand.u32 2147483647, %v130_v12  ;;  %v129_v15 = vadd.f32 %v158_v10, %v120_v13  ;;  %v132_v26 = vmax.f32 %v130_v12, 0.0 }
  0xd3   :  { %v136_v16 = vsub.f32 0.0, %v134_v14  ;;  %v133_v17 = vand.u32 2147483647, %v129_v15  ;;  %v131_v30 = vmax.f32 %v129_v15, 0.0 }
  0xd5   :  { %v139_v18 = vmul.f32 1.442695, %v136_v16  ;;  %v135_v19 = vsub.f32 0.0, %v133_v17 }
  0xd7   :  { %168 = vpow2.f32 %v139_v18  ;;  %v137_v20 = vmul.f32 1.442695, %v135_v19 }
  0xd9   :  { %170 = vpow2.f32 %v137_v20 }
  0xe4   :  { %v169_v21 = vpop.eup %168 }
  0xe5   :  { %v142_v22 = vadd.f32 1.0, %v169_v21 }
  0xe6   :  { %v171_v23 = vpop.eup %170 }
  0xe7   :  { %172 = vlog2.f32 %v142_v22  ;;  %v141_v24 = vadd.f32 1.0, %v171_v23 }
  0xe9   :  { %174 = vlog2.f32 %v141_v24 }
  0xf4   :  { %v173_v25 = vpop.eup %172 }
  0xf5   :  { %v146_v27 = vmul.f32 0.6931472, %v173_v25 }
  0xf6   :  { %v175_v28 = vpop.eup %174 }
  0xf7   :  { %v148_v29 = vadd.f32 %v146_v27, %v132_v26  ;;  %v144_v31 = vmul.f32 0.6931472, %v175_v28 }
  0xf9   :  { %150 = vst.msk [vmem:[%s224_s3 + $0x8] sm:$0xff] %vm18_vm2, %v148_v29  ;;  %v147_v32 = vadd.f32 %v144_v31, %v131_v30 }
  0xfb   :  { %149 = vst.msk [vmem:[%s224_s3] sm:$0xff] %vm18_vm2, %v147_v32 }

// kernel: forward.33
= control target key start
LH: loop header
LB: loop body
LE: loop exit
PB: predicated region body
PF: predicated region fallthrough
CT: control target
= control target key end

     0   :  { %s678_s15 = smov 0   ;;  %s680_s16 = smov 0   ;;  %s774_s0 = inlined_call_operand.vmem [shape: f32[2,8,32], index: 0, kind: input, shape index: {}]   ;;  %s775_s1 = inlined_call_operand.vmem [shape: f32[2,8,32], index: 1, kind: input, shape index: {}]   ;;  %s776_s2 = inlined_call_operand.vmem [shape: f32[2,8,16], index: 2, kind: input, shape index: {}]   ;;  %s777_s3 = inlined_call_operand.vmem [shape: f32[16,32], index: 3, kind: input, shape index: {}]   ;;  %s778_s4 = inlined_call_operand.vmem [shape: f32[2,8,32], index: 4, kind: output, shape index: {}]  }
   0x1   :  { %s682_s17 = smov 0  }
   0x2 LB: > { %s26_s18 = sadd.s32 1, %s640_s16  ;;  %p552_p0 = scmp.ge.s32.totalorder %s644_s17, 1  ;;  %s644_s17 = sphi %s682_s17, %s14_s17   ;;  %s640_s16 = sphi %s680_s16, %s780_s16   ;;  %s636_s15 = sphi %s678_s15, %s779_s15  }
   0x3   : > { %p28_p1 = scmp.ge.s32.totalorder %s26_s18, 2  ;;  %p212_p2 = scmp.lt.s32.totalorder %s644_s17, 3 }
   0x5   : > { %s782_s18 = smov (%p28_p1, %s26_s18), 0  ;;  %p213_p3 = pnand %p552_p0, %p212_p2 }
   0x6   : > { %p257_p4 = scmp.lt.s32.totalorder (!%p213_p3), %s636_s15, 1  ;;  %s726_s10 = smov (!%p213_p3), 0  }
   0x7   : > { %216 = sbr.rel (%p213_p3) target bundleno = 248 (0xf8), region = 36 }
   0xc   : > { %v699_v0 = vld [vmem:[%s777_s3] sm:$0xff]  ;;  %v704_v1 = vld [vmem:[%s777_s3 + $0x8] sm:$0xff]  ;;  %vm288_vm0 = vcmask 261120   ;;  %v650_v2 = vmov 0.0   ;;  %s784_s15 = smov (!%p257_p4, %s636_s15), 1 }
   0xd   : > { %289 = vst.msk [vmem:[#allocation2] sm:$0xff] %vm288_vm0, %v650_v2  ;;  %290 = vst.msk [vmem:[#allocation2 + $0x8] sm:$0xff] %vm288_vm0, %v650_v2  ;;  %s708_s23 = sshll.u32 %s784_s15, 3 }
   0xe   : > { %s263_s26 = scalar_lea.vmem %s774_s0, %s708_s23  ;;  %s270_s29 = scalar_lea.vmem %s775_s1, %s708_s23 }
   0xf   : > { %s274_s6 = scalar_lea.vmem %s776_s2, %s708_s23  ;;  %s285_s9 = scalar_lea.vmem %s778_s4, %s708_s23 }
  0x10 LB: >> { %v651_v3 = vmov 0.0   ;;  %s557_s11 = sadd.s32 4294967295, %s648_s10  ;;  %vm652_vm1 = vmmov 0   ;;  %v320_v4 = vadd.f32 1e-10, %v699_v0  ;;  %s342_s24 = scalar_lea.vmem %s274_s6, %s648_s10  ;;  %vm344_vm4 = vcmask 130048   ;;  %s648_s10 = sphi %s726_s10, %s296_s10  }
  0x11   : >> { %568 = vmatprep.subr.mxu0 %v651_v3  ;;  %572 = vmatprep.mubr.msk.f32.mxu0 %vm652_vm1, %v651_v3  ;;  %p298_p5 = scmp.gt.s32.totalorder %s557_s11, 0  ;;  %v321_v6 = vadd.f32 1e-10, %v704_v1  ;;  %v314_v12 = vand.u32 2147483647, %v699_v0  ;;  %s418_s28 = scalar_lea.vmem %s285_s9, %s648_s10  ;;  %vm419_vm5 = vcmask 253952  }
  0x12   : >> { %610 = vrcp.f32 %v320_v4  ;;  %v315_v14 = vand.u32 2147483647, %v704_v1  ;;  %v343_v32 = vld [vmem:[%s342_s24] sm:$0x1]  ;;  %s296_s10 = sadd.s32 1, %s648_s10  }
  0x13   : >> { %s786_s11 = smov (!%p298_p5, %s557_s11), 0  ;;  %612 = vrcp.f32 %v321_v6  ;;  %vm316_vm2 = vcmp.lt.f32.partialorder %v314_v12, 1e-05  ;;  %p293_p6 = scmp.ge.s32.totalorder %s296_s10, 8  }
  0x14   : >> { %s300_s14 = scalar_lea.vmem %s263_s26, %s786_s11  ;;  %s302_s20 = scalar_lea.vmem %s270_s29, %s786_s11  ;;  %v328_v18 = vld [vmem:[#allocation2] sm:$0xff]  ;;  %v329_v20 = vld [vmem:[#allocation2 + $0x8] sm:$0xff]  ;;  %vm317_vm3 = vcmp.lt.f32.partialorder %v315_v14, 1e-05 }
  0x15   : >> { %v558_v5 = vld [vmem:[%s300_s14] ss:$0 sm:$0xff] }
  0x16   : >> { %v308_v7 = vmul.f32 %v558_v5, %v699_v0  ;;  %v309_v8 = vmul.f32 %v558_v5, %v704_v1  ;;  %v561_v22 = vld [vmem:[%s302_s20] ss:$0 sm:$0xff] }
  0x18   : >> { %v310_v9 = vmul.f32 1.442695, %v308_v7  ;;  %v312_v10 = vmul.f32 1.442695, %v309_v8 }
  0x1a   : >> { %614 = vpow2.f32 %v310_v9 }
  0x1b   : >> { %616 = vpow2.f32 %v312_v10 }
  0x1f   : >> { %v611_v11 = vpop.eup %610 }
  0x20   : >> { %v613_v13 = vpop.eup %612 }
  0x27   : >> { %v615_v15 = vpop.eup %614 }
  0x28   : >> { %v617_v16 = vpop.eup %616  ;;  %v559_v17 = vadd.f32 -1.0, %v615_v15  ;;  %v330_v24 = vmul.f32 %v615_v15, %v328_v18 }
  0x29   : >> { %v560_v19 = vadd.f32 -1.0, %v617_v16  ;;  %v331_v26 = vmul.f32 %v617_v16, %v329_v20 }
  0x2a   : >> { %v323_v21 = vmul.f32 %v611_v11, %v559_v17 }
  0x2b   : >> { %v325_v23 = vmul.f32 %v613_v13, %v560_v19 }
  0x2c   : >> { %v326_v25 = vsel %vm316_vm2, %v558_v5, %v323_v21 }
  0x2d   : >> { %v327_v27 = vsel %vm317_vm3, %v558_v5, %v325_v23  ;;  %v336_v28 = vmul.f32 %v561_v22, %v326_v25 }
  0x2e   : >> { %v337_v29 = vmul.f32 %v561_v22, %v327_v27 }
  0x2f   : >> { %v338_v30 = vadd.f32 %v336_v28, %v330_v24 }
  0x30   : >> { %v339_v31 = vadd.f32 %v337_v29, %v331_v26 }
  0x31   : >> { %340 = vst.msk [vmem:[#allocation2] sm:$0xff] %vm288_vm0, %v338_v30 }
  0x32   : >> { %341 = vst.msk [vmem:[#allocation2 + $0x8] sm:$0xff] %vm288_vm0, %v339_v31  ;;  %569 = vmatpush3.msra.mxu0 %v339_v31 }
  0x33   : >> { %570 = vmatprep.subr.mxu0 %v651_v3 }
  0x34   : >> { %571 = vmatpush3.msra.mxu0 %v338_v30 }
  0x35   : >> { %573 = vmatmul.mubr.msk.f32.vlgmr.msra.gmra.mxu0 %vm344_vm4, %v343_v32 }
  0xf3   : > { %295 = sbr.rel (!%p293_p6) target bundleno = 16 (0x10), region = 86 }
  0xf5   : >> { %v414_v33 = vpop.f32.mrf.mxu0 }
  0xf6   : >> { %420 = vst.msk [vmem:[%s418_s28] sm:$0x1] %vm419_vm5, %v414_v33 }
  0xf7   : >> { %v574_v34 = vpop.f32.mrf.mxu0 }
  0xf8 PF: > { %s14_s17 = sadd.s32 1, %s644_s17   ;;  %s779_s15 = smov %s640_s16 }
  0xf9   : > { %p11_p7 = scmp.ge.s32.totalorder %s14_s17, 4   ;;  %s780_s16 = smov %s782_s18 }
  0xfb   :  { %13 = sbr.rel (!%p11_p7) target bundleno = 2 (0x2), region = 97 }

// kernel: forward.29
= control target key start
LH: loop header
LB: loop body
LE: loop exit
PB: predicated region body
PF: predicated region fallthrough
CT: control target
= control target key end

     0   :  { %vm15_vm0 = vcmask 261120   ;;  %v143_v2 = vmov 0.0   ;;  %s191_s1 = inlined_call_operand.vmem [shape: f32[32,32], index: 1, kind: input, shape index: {}]   ;;  %s192_s0 = inlined_call_operand.vmem [shape: f32[16,32], index: 0, kind: input, shape index: {}]   ;;  %s193_s2 = inlined_call_operand.vmem [shape: f32[16,32], index: 2, kind: output, shape index: {}]  }
   0x1   :  { %v25_v0 = vld [vmem:[%s191_s1 + $0x18] sm:$0xff]  ;;  %v24_v1 = vld [vmem:[%s191_s1 + $0x10] sm:$0xff]  ;;  %17 = vst.msk [vmem:[#allocation2 + $0x8] sm:$0xff] %vm15_vm0, %v143_v2  ;;  %16 = vst.msk [vmem:[#allocation2] sm:$0xff] %vm15_vm0, %v143_v2 }
   0x2   :  { %131 = vmatprep.subr.mxu0 %v25_v0  ;;  %v20_v3 = vld [vmem:[%s192_s0] sm:$0xff]  ;;  %v23_v4 = vld [vmem:[%s191_s1 + $0x8] sm:$0xff] }
   0x3   :  { %132 = vmatpush3.msra.mxu0 %v25_v0  ;;  %139 = vmatprep.mubr.msk.f32.mxu0 %vm15_vm0, %v20_v3  ;;  %v22_v5 = vld [vmem:[%s191_s1] sm:$0xff]  ;;  %v21_v6 = vld [vmem:[%s192_s0 + $0x8] sm:$0xff] }
   0x4   :  { %133 = vmatprep.subr.mxu0 %v24_v1 }
   0x5   :  { %134 = vmatpush3.msra.mxu0 %v24_v1 }
   0x6   :  { %135 = vmatprep.subr.mxu0 %v23_v4 }
   0x7   :  { %136 = vmatpush3.msra.mxu0 %v23_v4 }
   0x8   :  { %137 = vmatprep.subr.mxu0 %v22_v5  ;;  %v19_v7 = vld [vmem:[#allocation2 + $0x8] sm:$0xff]  ;;  %v18_v9 = vld [vmem:[#allocation2] sm:$0xff] }
   0x9   :  { %138 = vmatpush3.msra.mxu0 %v22_v5 }
   0xa   :  { %140 = vmatmul.mubr.msk.f32.vlgmr.msra.gmra.mxu0 %vm15_vm0, %v21_v6 }
  0xca   :  { %v141_v8 = vpop.f32.mrf.mxu0 }
  0xcb   :  { %v109_v10 = vadd.f32 %v141_v8, %v19_v7 }
  0xcc   :  { %v99_v11 = vpop.f32.mrf.mxu0 }
  0xcd   :  { %111 = vst.msk [vmem:[#allocation2 + $0x8] sm:$0xff] %vm15_vm0, %v109_v10  ;;  %v108_v12 = vadd.f32 %v99_v11, %v18_v9 }
  0xcf   :  { %110 = vst.msk [vmem:[#allocation2] sm:$0xff] %vm15_vm0, %v108_v12 }
  0xd4   :  { %v116_v13 = vld [vmem:[#allocation2 + $0x8] sm:$0xff] }
  0xd5   :  { %118 = vst.msk [vmem:[%s193_s2 + $0x8] sm:$0xff] %vm15_vm0, %v116_v13 }
  0xd6   :  { %v115_v14 = vld [vmem:[#allocation2] sm:$0xff] }
  0xd7   :  { %117 = vst.msk [vmem:[%s193_s2] sm:$0xff] %vm15_vm0, %v115_v14 }

// kernel: forward.35
= control target key start
LH: loop header
LB: loop body
LE: loop exit
PB: predicated region body
PF: predicated region fallthrough
CT: control target
= control target key end

     0   :  { %vm18_vm0 = vcmask 261120   ;;  %v150_v2 = vmov 0.0   ;;  %s209_s1 = inlined_call_operand.vmem [shape: f32[32,32], index: 1, kind: input, shape index: {}]   ;;  %s210_s0 = inlined_call_operand.vmem [shape: f32[16,32], index: 0, kind: input, shape index: {}]   ;;  %s211_s2 = inlined_call_operand.vmem [shape: f32[16,32], index: 2, kind: input, shape index: {}]   ;;  %s212_s3 = inlined_call_operand.vmem [shape: f32[16,32], index: 3, kind: output, shape index: {}]  }
   0x1   :  { %v28_v0 = vld [vmem:[%s209_s1 + $0x18] sm:$0xff]  ;;  %v27_v1 = vld [vmem:[%s209_s1 + $0x10] sm:$0xff]  ;;  %20 = vst.msk [vmem:[#allocation2 + $0x8] sm:$0xff] %vm18_vm0, %v150_v2  ;;  %19 = vst.msk [vmem:[#allocation2] sm:$0xff] %vm18_vm0, %v150_v2 }
   0x2   :  { %138 = vmatprep.subr.mxu0 %v28_v0  ;;  %v23_v3 = vld [vmem:[%s210_s0] sm:$0xff]  ;;  %v26_v4 = vld [vmem:[%s209_s1 + $0x8] sm:$0xff] }
   0x3   :  { %139 = vmatpush3.msra.mxu0 %v28_v0  ;;  %146 = vmatprep.mubr.msk.f32.mxu0 %vm18_vm0, %v23_v3  ;;  %v25_v5 = vld [vmem:[%s209_s1] sm:$0xff]  ;;  %v24_v6 = vld [vmem:[%s210_s0 + $0x8] sm:$0xff] }
   0x4   :  { %140 = vmatprep.subr.mxu0 %v27_v1  ;;  %v121_v13 = vld [vmem:[%s211_s2 + $0x8] sm:$0xff]  ;;  %v120_v15 = vld [vmem:[%s211_s2] sm:$0xff] }
   0x5   :  { %141 = vmatpush3.msra.mxu0 %v27_v1 }
   0x6   :  { %142 = vmatprep.subr.mxu0 %v26_v4 }
   0x7   :  { %143 = vmatpush3.msra.mxu0 %v26_v4 }
   0x8   :  { %144 = vmatprep.subr.mxu0 %v25_v5  ;;  %v22_v7 = vld [vmem:[#allocation2 + $0x8] sm:$0xff]  ;;  %v21_v9 = vld [vmem:[#allocation2] sm:$0xff] }
   0x9   :  { %145 = vmatpush3.msra.mxu0 %v25_v5 }
   0xa   :  { %147 = vmatmul.mubr.msk.f32.vlgmr.msra.gmra.mxu0 %vm18_vm0, %v24_v6 }
  0xca   :  { %v148_v8 = vpop.f32.mrf.mxu0 }
  0xcb   :  { %v112_v10 = vadd.f32 %v148_v8, %v22_v7 }
  0xcc   :  { %v102_v11 = vpop.f32.mrf.mxu0 }
  0xcd   :  { %114 = vst.msk [vmem:[#allocation2 + $0x8] sm:$0xff] %vm18_vm0, %v112_v10  ;;  %v111_v12 = vadd.f32 %v102_v11, %v21_v9 }
  0xcf   :  { %113 = vst.msk [vmem:[#allocation2] sm:$0xff] %vm18_vm0, %v111_v12 }
  0xd4   :  { %v119_v14 = vld [vmem:[#allocation2 + $0x8] sm:$0xff] }
  0xd5   :  { %v123_v16 = vadd.f32 %v121_v13, %v119_v14 }
  0xd6   :  { %v118_v17 = vld [vmem:[#allocation2] sm:$0xff] }
  0xd7   :  { %125 = vst.msk [vmem:[%s212_s3 + $0x8] sm:$0xff] %vm18_vm0, %v123_v16  ;;  %v122_v18 = vadd.f32 %v120_v15, %v118_v17 }
  0xd9   :  { %124 = vst.msk [vmem:[%s212_s3] sm:$0xff] %vm18_vm0, %v122_v18 }

// kernel: forward.34
= control target key start
LH: loop header
LB: loop body
LE: loop exit
PB: predicated region body
PF: predicated region fallthrough
CT: control target
= control target key end

     0   :  { %vm50_vm0 = vcmask 261120   ;;  %s118_s2 = inlined_call_operand.vmem [shape: f32[16,32], index: 2, kind: input, shape index: {}]   ;;  %s119_s1 = inlined_call_operand.vmem [shape: f32[16,32], index: 1, kind: input, shape index: {}]   ;;  %s120_s3 = inlined_call_operand.vmem [shape: f32[1,32], index: 3, kind: input, shape index: {}]   ;;  %s121_s0 = inlined_call_operand.vmem [shape: f32[16,32], index: 0, kind: input, shape index: {}]   ;;  %s122_s4 = inlined_call_operand.vmem [shape: f32[16,32], index: 4, kind: output, shape index: {}]  }
   0x1   :  { %v17_v0 = vld [vmem:[%s118_s2] sm:$0xff]  ;;  %v18_v2 = vld [vmem:[%s118_s2 + $0x8] sm:$0xff] }
   0x2   :  { %v34_v1 = vsub.f32 0.0, %v17_v0  ;;  %v35_v3 = vsub.f32 0.0, %v18_v2  ;;  %v21_v10 = vld [vmem:[%s119_s1] sm:$0xff]  ;;  %v22_v12 = vld [vmem:[%s119_s1 + $0x8] sm:$0xff] }
   0x3   :  { %v57_v11 = vld [vmem:[%s120_s3] ss:$0 sm:$0xff]  ;;  %v20_v16 = vld [vmem:[%s121_s0 + $0x8] sm:$0xff] }
   0x4   :  { %v36_v4 = vmul.f32 1.442695, %v34_v1  ;;  %v38_v5 = vmul.f32 1.442695, %v35_v3  ;;  %v30_v13 = vmul.f32 %v57_v11, %v21_v10  ;;  %v19_v14 = vld [vmem:[%s121_s0] sm:$0xff]  ;;  %v31_v15 = vmul.f32 %v57_v11, %v22_v12 }
   0x6   :  { %58 = vpow2.f32 %v36_v4  ;;  %v32_v17 = vadd.f32 %v30_v13, %v19_v14  ;;  %v33_v19 = vadd.f32 %v31_v15, %v20_v16 }
   0x7   :  { %60 = vpow2.f32 %v38_v5 }
  0x13   :  { %v59_v6 = vpop.eup %58 }
  0x14   :  { %v61_v7 = vpop.eup %60  ;;  %v40_v8 = vadd.f32 1.0, %v59_v6 }
  0x15   :  { %v41_v9 = vadd.f32 1.0, %v61_v7 }
  0x16   :  { %62 = vrcp.f32 %v40_v8 }
  0x17   :  { %64 = vrcp.f32 %v41_v9 }
  0x23   :  { %v63_v18 = vpop.eup %62 }
  0x24   :  { %v65_v20 = vpop.eup %64  ;;  %v46_v21 = vmul.f32 %v63_v18, %v17_v0 }
  0x25   :  { %v47_v22 = vmul.f32 %v65_v20, %v18_v2 }
  0x26   :  { %v48_v23 = vmul.f32 %v46_v21, %v32_v17 }
  0x27   :  { %v49_v24 = vmul.f32 %v47_v22, %v33_v19 }
  0x28   :  { %51 = vst.msk [vmem:[%s122_s4] sm:$0xff] %vm50_vm0, %v48_v23 }
  0x29   :  { %52 = vst.msk [vmem:[%s122_s4 + $0x8] sm:$0xff] %vm50_vm0, %v49_v24 }

// kernel: forward.37
= control target key start
LH: loop header
LB: loop body
LE: loop exit
PB: predicated region body
PF: predicated region fallthrough
CT: control target
= control target key end

     0   :  { %vm28_vm0 = vcmask 261120   ;;  %s217_s1 = inlined_call_operand.vmem [shape: f32[32,128], index: 1, kind: input, shape index: {}]   ;;  %s218_s0 = inlined_call_operand.vmem [shape: f32[16,32], index: 0, kind: input, shape index: {}]   ;;  %s219_s2 = inlined_call_operand.vmem [shape: f32[1,128], index: 2, kind: input, shape index: {}]   ;;  %s220_s3 = inlined_call_operand.vmem [shape: f32[16,128], index: 3, kind: output, shape index: {}]  }
   0x1   :  { %v27_v0 = vld [vmem:[%s217_s1 + $0x18] sm:$0xff]  ;;  %v26_v1 = vld [vmem:[%s217_s1 + $0x10] sm:$0xff]  ;;  %v22_v2 = vld [vmem:[%s218_s0] sm:$0xff] }
   0x2   :  { %153 = vmatprep.subr.mxu0 %v27_v0  ;;  %v25_v3 = vld [vmem:[%s217_s1 + $0x8] sm:$0xff]  ;;  %161 = vmatprep.mubr.msk.f32.mxu0 %vm28_vm0, %v22_v2  ;;  %v24_v4 = vld [vmem:[%s217_s1] sm:$0xff] }
   0x3   :  { %154 = vmatpush3.msra.mxu0 %v27_v0  ;;  %v23_v5 = vld [vmem:[%s218_s0 + $0x8] sm:$0xff]  ;;  %v146_v6 = vld [vmem:[%s219_s2] ss:$0 sm:$0xff] }
   0x4   :  { %155 = vmatprep.subr.mxu0 %v26_v1 }
   0x5   :  { %156 = vmatpush3.msra.mxu0 %v26_v1 }
   0x6   :  { %157 = vmatprep.subr.mxu0 %v25_v3 }
   0x7   :  { %158 = vmatpush3.msra.mxu0 %v25_v3 }
   0x8   :  { %159 = vmatprep.subr.mxu0 %v24_v4 }
   0x9   :  { %160 = vmatpush3.msra.mxu0 %v24_v4 }
   0xa   :  { %162 = vmatmul.mubr.msk.f32.vlgmr.msra.gmra.mxu0 %vm28_vm0, %v23_v5 }
  0xca   :  { %v163_v7 = vpop.f32.mrf.mxu0 }
  0xcb   :  { %v127_v8 = vadd.f32 %v163_v7, %v146_v6 }
  0xcc   :  { %v101_v9 = vpop.f32.mrf.mxu0 }
  0xcd   :  { %v131_v10 = vmul.f32 0.70710677, %v127_v8  ;;  %v126_v11 = vadd.f32 %v146_v6, %v101_v9  ;;  %v129_v14 = vmul.f32 0.5, %v127_v8 }
  0xcf   :  { %164 = verf.f32 %v131_v10  ;;  %v130_v12 = vmul.f32 0.70710677, %v126_v11  ;;  %v128_v18 = vmul.f32 0.5, %v126_v11 }
  0xd1   :  { %166 = verf.f32 %v130_v12 }
  0xdc   :  { %v165_v13 = vpop.eup %164 }
  0xdd   :  { %v135_v15 = vadd.f32 1.0, %v165_v13 }
  0xde   :  { %v167_v16 = vpop.eup %166 }
  0xdf   :  { %v137_v17 = vmul.f32 %v135_v15, %v129_v14  ;;  %v134_v19 = vadd.f32 1.0, %v167_v16 }
  0xe1   :  { %139 = vst [vmem:[%s220_s3 + $0x8] sm:$0xff] %v137_v17  ;;  %v136_v20 = vmul.f32 %v134_v19, %v128_v18 }
  0xe3   :  { %138 = vst [vmem:[%s220_s3] sm:$0xff] %v136_v20 }

// kernel: forward.38
= control target key start
LH: loop header
LB: loop body
LE: loop exit
PB: predicated region body
PF: predicated region fallthrough
CT: control target
= control target key end

     0   :  { %vm21_vm0 = vcmask 261120   ;;  %v203_v2 = vmov 0.0   ;;  %s304_s1 = inlined_call_operand.vmem [shape: f32[128,32], index: 1, kind: input, shape index: {}]   ;;  %s305_s0 = inlined_call_operand.vmem [shape: f32[16,128], index: 0, kind: input, shape index: {}]   ;;  %s306_s2 = inlined_call_operand.vmem [shape: f32[1,32], index: 2, kind: input, shape index: {}]   ;;  %s307_s3 = inlined_call_operand.vmem [shape: f32[16,32], index: 3, kind: input, shape index: {}]   ;;  %s308_s4 = inlined_call_operand.vmem [shape: f32[16,32], index: 4, kind: output, shape index: {}]  }
   0x1   :  { %v43_v0 = vld [vmem:[%s304_s1 + $0x78] sm:$0xff]  ;;  %v42_v1 = vld [vmem:[%s304_s1 + $0x70] sm:$0xff]  ;;  %23 = vst.msk [vmem:[#allocation2 + $0x8] sm:$0xff] %vm21_vm0, %v203_v2  ;;  %22 = vst.msk [vmem:[#allocation2] sm:$0xff] %vm21_vm0, %v203_v2 }
   0x2   :  { %167 = vmatprep.subr.mxu0 %v43_v0  ;;  %v41_v3 = vld [vmem:[%s304_s1 + $0x68] sm:$0xff]  ;;  %v40_v4 = vld [vmem:[%s304_s1 + $0x60] sm:$0xff]  ;;  %v39_v6 = vld [vmem:[%s304_s1 + $0x58] sm:$0xff] }
   0x3   :  { %168 = vmatpush3.msra.mxu0 %v43_v0  ;;  %v26_v5 = vld [vmem:[%s305_s0] sm:$0xff]  ;;  %v38_v7 = vld [vmem:[%s304_s1 + $0x50] sm:$0xff]  ;;  %v37_v8 = vld [vmem:[%s304_s1 + $0x48] sm:$0xff] }
   0x4   :  { %169 = vmatprep.subr.mxu0 %v42_v1  ;;  %199 = vmatprep.mubr.f32.mxu0 %v26_v5  ;;  %v36_v9 = vld [vmem:[%s304_s1 + $0x40] sm:$0xff]  ;;  %v35_v10 = vld [vmem:[%s304_s1 + $0x38] sm:$0xff]  ;;  %v34_v11 = vld [vmem:[%s304_s1 + $0x30] sm:$0xff] }
   0x5   :  { %170 = vmatpush3.msra.mxu0 %v42_v1  ;;  %v33_v12 = vld [vmem:[%s304_s1 + $0x28] sm:$0xff]  ;;  %v32_v13 = vld [vmem:[%s304_s1 + $0x20] sm:$0xff]  ;;  %v31_v14 = vld [vmem:[%s304_s1 + $0x18] sm:$0xff] }
   0x6   :  { %171 = vmatprep.subr.mxu0 %v41_v3  ;;  %v30_v15 = vld [vmem:[%s304_s1 + $0x10] sm:$0xff]  ;;  %v29_v16 = vld [vmem:[%s304_s1 + $0x8] sm:$0xff]  ;;  %v28_v17 = vld [vmem:[%s304_s1] sm:$0xff] }
   0x7   :  { %172 = vmatpush3.msra.mxu0 %v41_v3  ;;  %v27_v18 = vld [vmem:[%s305_s0 + $0x8] sm:$0xff]  ;;  %v148_v25 = vld [vmem:[%s306_s2] ss:$0 sm:$0xff] }
   0x8   :  { %173 = vmatprep.subr.mxu0 %v40_v4  ;;  %v25_v19 = vld [vmem:[#allocation2 + $0x8] sm:$0xff]  ;;  %v24_v21 = vld [vmem:[#allocation2] sm:$0xff] }
   0x9   :  { %174 = vmatpush3.msra.mxu0 %v40_v4  ;;  %v139_v27 = vld [vmem:[%s307_s3 + $0x8] sm:$0xff]  ;;  %v138_v29 = vld [vmem:[%s307_s3] sm:$0xff] }
   0xa   :  { %175 = vmatprep.subr.mxu0 %v39_v6 }
   0xb   :  { %176 = vmatpush3.msra.mxu0 %v39_v6 }
   0xc   :  { %177 = vmatprep.subr.mxu0 %v38_v7 }
   0xd   :  { %178 = vmatpush3.msra.mxu0 %v38_v7 }
   0xe   :  { %179 = vmatprep.subr.mxu0 %v37_v8 }
   0xf   :  { %180 = vmatpush3.msra.mxu0 %v37_v8 }
  0x10   :  { %181 = vmatprep.subr.mxu0 %v36_v9 }
  0x11   :  { %182 = vmatpush3.msra.mxu0 %v36_v9 }
  0x12   :  { %183 = vmatprep.subr.mxu0 %v35_v10 }
  0x13   :  { %184 = vmatpush3.msra.mxu0 %v35_v10 }
  0x14   :  { %185 = vmatprep.subr.mxu0 %v34_v11 }
  0x15   :  { %186 = vmatpush3.msra.mxu0 %v34_v11 }
  0x16   :  { %187 = vmatprep.subr.mxu0 %v33_v12 }
  0x17   :  { %188 = vmatpush3.msra.mxu0 %v33_v12 }
  0x18   :  { %189 = vmatprep.subr.mxu0 %v32_v13 }
  0x19   :  { %190 = vmatpush3.msra.mxu0 %v32_v13 }
  0x1a   :  { %191 = vmatprep.subr.mxu0 %v31_v14 }
  0x1b   :  { %192 = vmatpush3.msra.mxu0 %v31_v14 }
  0x1c   :  { %193 = vmatprep.subr.mxu0 %v30_v15 }
  0x1d   :  { %194 = vmatpush3.msra.mxu0 %v30_v15 }
  0x1e   :  { %195 = vmatprep.subr.mxu0 %v29_v16 }
  0x1f   :  { %196 = vmatpush3.msra.mxu0 %v29_v16 }
  0x20   :  { %197 = vmatprep.subr.mxu0 %v28_v17 }
  0x21   :  { %198 = vmatpush3.msra.mxu0 %v28_v17 }
  0x22   :  { %200 = vmatmul.mubr.f32.vlgmr.msra.gmra.mxu0 %v27_v18 }
  0xe2   :  { %v201_v20 = vpop.f32.mrf.mxu0 }
  0xe3   :  { %v120_v22 = vadd.f32 %v201_v20, %v25_v19 }
  0xe4   :  { %v110_v23 = vpop.f32.mrf.mxu0 }
  0xe5   :  { %123 = vst.msk [vmem:[#allocation2 + $0x8] sm:$0xff] %vm21_vm0, %v120_v22  ;;  %v119_v24 = vadd.f32 %v110_v23, %v24_v21 }
  0xe7   :  { %122 = vst.msk [vmem:[#allocation2] sm:$0xff] %vm21_vm0, %v119_v24 }
  0xec   :  { %v128_v26 = vld [vmem:[#allocation2 + $0x8] sm:$0xff] }
  0xed   :  { %v137_v28 = vadd.f32 %v148_v25, %v128_v26 }
  0xee   :  { %v127_v30 = vld [vmem:[#allocation2] sm:$0xff] }
  0xef   :  { %v141_v31 = vadd.f32 %v139_v27, %v137_v28  ;;  %v136_v32 = vadd.f32 %v148_v25, %v127_v30 }
  0xf1   :  { %143 = vst.msk [vmem:[%s308_s4 + $0x8] sm:$0xff] %vm21_vm0, %v141_v31  ;;  %v140_v33 = vadd.f32 %v138_v29, %v136_v32 }
  0xf3   :  { %142 = vst.msk [vmem:[%s308_s4] sm:$0xff] %vm21_vm0, %v140_v33 }

// kernel: forward.51
= control target key start
LH: loop header
LB: loop body
LE: loop exit
PB: predicated region body
PF: predicated region fallthrough
CT: control target
= control target key end

     0   :  { %vm30_vm0 = vcmask 261120   ;;  %vm19_vm1 = vcmask 523264   ;;  %v195_v3 = vmov 0.0   ;;  %s251_s0 = inlined_call_operand.vmem [shape: f32[16,32], index: 0, kind: input, shape index: {}]   ;;  %s252_s1 = inlined_call_operand.vmem [shape: f32[32,64], index: 1, kind: input, shape index: {}]   ;;  %s253_s2 = inlined_call_operand.vmem [shape: f32[1,64], index: 2, kind: input, shape index: {}]   ;;  %s254_s3 = inlined_call_operand.hbm [shape: f32[16,64], index: 3, kind: output, shape index: {}]  }
   0x1   :  { %v29_v0 = vld [vmem:[%s252_s1 + $0x18] sm:$0xff]  ;;  %v28_v1 = vld [vmem:[%s252_s1 + $0x10] sm:$0xff]  ;;  %v24_v2 = vld [vmem:[%s251_s0] sm:$0xff]  ;;  %21 = vst.msk [vmem:[#allocation2 + $0x8] sm:$0xff] %vm19_vm1, %v195_v3 }
   0x2   :  { %158 = vmatprep.subr.mxu0 %v29_v0  ;;  %20 = vst.msk [vmem:[#allocation2] sm:$0xff] %vm19_vm1, %v195_v3  ;;  %v27_v4 = vld [vmem:[%s252_s1 + $0x8] sm:$0xff]  ;;  %166 = vmatprep.mubr.msk.f32.mxu0 %vm30_vm0, %v24_v2 }
   0x3   :  { %159 = vmatpush3.msra.mxu0 %v29_v0 }
   0x4   :  { %8 = vsyncpa [#allocation4], 0  ;;  %160 = vmatprep.subr.mxu0 %v28_v1  ;;  %v26_v5 = vld [vmem:[%s252_s1] sm:$0xff]  ;;  %v25_v6 = vld [vmem:[%s251_s0 + $0x8] sm:$0xff]  ;;  %s196_s25 = smov [#allocation3]  }
   0x5   :  { %161 = vmatpush3.msra.mxu0 %v28_v1  ;;  %v151_v13 = vld [vmem:[%s253_s2] ss:$0 sm:$0xff]  ;;  %s138_s0 = sshll.u32 %s196_s25, 4  ;;  %s139_s0 = int_to_ptr.vmem [resolvable:$true] %s138_s0 }
   0x6   :  { %162 = vmatprep.subr.mxu0 %v27_v4  ;;  %s173_s26 = scalar_lea.vmem %s139_s0, 256  ;;  %p178_p1 = scmp.lt.s32.totalorder %s139_s0, %s139_s0 }
   0x7   :  { %163 = vmatpush3.msra.mxu0 %v27_v4  ;;  %p174_p0 = scmp.ne.s32.totalorder %s139_s0, %s173_s26  ;;  %p179_p2 = scmp.lt.s32.totalorder %s173_s26, %s173_s26 }
   0x8   :  { %164 = vmatprep.subr.mxu0 %v26_v5  ;;  %v23_v7 = vld [vmem:[#allocation2 + $0x8] sm:$0xff] }
   0x9   :  { %165 = vmatpush3.msra.mxu0 %v26_v5  ;;  %v22_v9 = vld [vmem:[#allocation2] sm:$0xff]  ;;  %p180_p3 = por %p179_p2, %p178_p1 }
   0xa   :  { %167 = vmatmul.mubr.msk.f32.vlgmr.msra.gmra.mxu0 %vm30_vm0, %v25_v6 }
   0xb   :  { %p181_p4 = pnand %p180_p3, %p174_p0 }
  0xca   :  { %v168_v8 = vpop.f32.mrf.mxu0 }
  0xcb   :  { %v113_v10 = vadd.f32 %v168_v8, %v23_v7 }
  0xcc   :  { %v103_v11 = vpop.f32.mrf.mxu0 }
  0xcd   :  { %116 = vst.msk [vmem:[#allocation2 + $0x8] sm:$0xff] %vm19_vm1, %v113_v10  ;;  %v112_v12 = vadd.f32 %v103_v11, %v22_v9 }
  0xcf   :  { %115 = vst.msk [vmem:[#allocation2] sm:$0xff] %vm19_vm1, %v112_v12 }
  0xd4   :  { %v121_v14 = vld [vmem:[#allocation2 + $0x8] sm:$0xff] }
  0xd5   :  { %v130_v15 = vadd.f32 %v151_v13, %v121_v14 }
  0xd6   :  { %v120_v16 = vld [vmem:[#allocation2] sm:$0xff] }
  0xd7   :  { %v129_v17 = vadd.f32 %v151_v13, %v120_v16  ;;  %132 = vst.msk [vmem:[#allocation3 + $0x8] sm:$0xff] %vm19_vm1, %v130_v15 }
  0xd9   :  { %131 = vst.msk [vmem:[#allocation3] sm:$0xff] %vm19_vm1, %v129_v17 }
  0xda   :  { %184 = shalt.err (!%p181_p4)
}
  0xdb   :  { %s197_s27 = smov 128   ;;  %s198_s2 = smov 8  }
  0xdc   :  { %144 = dma.vmem_to_hbm [thread:$0]  %s139_s0, 256, %s254_s3, [#allocation4], %s197_s27, %s197_s27, %s198_s2  }
  0xdd   :  { %193 = dma.done.wait [#allocation4], 256  }
  0xde   :  { %194 = vsyncadd [#allocation4], 4294967040 }
  0xdf   :  { %148 = vsyncpa [#allocation4], 1 }

</bundles_post_ra>
